<compile_context>
chip_gen: v6e
topology: v6e:2x2x1
jax: 0.10.0
libtpu: 0.0.40
codegen_flags: <defaults>
</compile_context>

<pallas_src>
import functools

import jax
import jax.numpy as jnp
import numpy as np
from jax.experimental import pallas as pl
from jax.experimental.pallas import tpu as pltpu

LANE = 128          # output channels padded to a full lane group
NEG_SLOPE = 0.01    # nn.LeakyReLU default negative slope


def _shift_rows(v, oy):
    # v: (N, S, S, C) -> w[n, y, x, c] = v[n, clamp(y + oy), x, c]  (edge clamp)
    if oy == -1:
        return jnp.concatenate([v[:, :1], v[:, :-1]], axis=1)
    if oy == 1:
        return jnp.concatenate([v[:, 1:], v[:, -1:]], axis=1)
    return v


def _shift_cols(v, ox):
    # v: (N, S, S, C) -> w[n, y, x, c] = v[n, y, clamp(x + ox), c]  (edge clamp)
    if ox == -1:
        return jnp.concatenate([v[:, :, :1], v[:, :, :-1]], axis=2)
    if ox == 1:
        return jnp.concatenate([v[:, :, 1:], v[:, :, -1:]], axis=2)
    return v


def _im2col_rep3x3(v):
    # v: (N, S, S, C) -> (N*S*S, 9*C) replication-padded 3x3 patches, built
    # entirely in registers (no VMEM scratch).  Resulting channel order is
    # (kx, ky, c), matching the weight reshape w.transpose(3,2,1,0) below.
    n, s, _, c = v.shape
    rows = jnp.concatenate([_shift_rows(v, oy) for oy in (-1, 0, 1)], axis=-1)
    pat = jnp.concatenate([_shift_cols(rows, ox) for ox in (-1, 0, 1)], axis=-1)
    return pat.reshape(n * s * s, 9 * c)


def _leaky(x):
    return jnp.where(x >= 0, x, NEG_SLOPE * x)


def _down_kernel(x_ref, w1_ref, b1_ref, w2_ref, b2_ref, o_ref, *,
                 S, KK, N, C_mid):
    # ---- AdaptiveMaxPool2d: max over the KK window taps (leading-dim slices)
    pooled = x_ref[0:N]                                   # (N, S, S, C_in)
    for t in range(1, KK):
        pooled = jnp.maximum(pooled, x_ref[t * N:(t + 1) * N])

    # ---- conv1: single im2col matmul + bias + LeakyReLU
    # HIGHEST keeps exact f32 semantics (matches the PyTorch module / 1e-4
    # test tolerance); at scale this would be relaxed to the bf16 MXU path.
    p1 = _im2col_rep3x3(pooled)                           # (M, 9*C_in)
    h1 = jnp.dot(p1, w1_ref[...],
                 preferred_element_type=jnp.float32,
                 precision=jax.lax.Precision.HIGHEST) + b1_ref[...]
    h1 = _leaky(h1)                                       # (M, C_mid)

    # ---- conv2: single im2col matmul into a lane-dense (M, 128) result
    p2 = _im2col_rep3x3(h1.reshape(N, S, S, C_mid))       # (M, 9*C_mid)
    h2 = jnp.dot(p2, w2_ref[...],
                 preferred_element_type=jnp.float32,
                 precision=jax.lax.Precision.HIGHEST) + b2_ref[...]
    o_ref[...] = _leaky(h2)                               # unmasked (M, 128) store


def down_forward(x_nchw, params, S):
    N, C, H, W = x_nchw.shape
    # TODO(synk): AdaptiveMaxPool2d is implemented only for the uniform-window
    # case (input spatial dims divisible by `shape`), as in the test below.
    assert H % S == 0 and W % S == 0
    k = H // S
    KK = k * k
    M = N * S * S
    w1, b1, w2, b2 = params
    C_mid = w1.shape[0]
    C_out = w2.shape[0]
    assert C_out <= LANE

    # --- layout glue (no compute): NCHW -> pooling-window-major NHWC slab ---
    # xg[t*N + n, sy, sx, c] = x[n, c, sy*k + t//k, sx*k + t%k]
    # TODO(synk): for large H,W this rearrangement is an extra HBM pass; it
    # could be folded into the kernel with strided window reads instead.
    x = jnp.transpose(x_nchw, (0, 2, 3, 1))                            # NHWC
    xg = x.reshape(N, S, k, S, k, C).transpose(2, 4, 0, 1, 3, 5)
    xg = xg.reshape(KK * N, S, S, C)

    # conv weights (O, I, 3, 3) -> im2col matrices with (kx, ky, i) row order
    w1m = jnp.transpose(w1, (3, 2, 1, 0)).reshape(9 * C, C_mid)
    b1m = b1.reshape(1, C_mid)
    # conv2: zero-pad output channels to LANE so the kernel store is unmasked.
    w2m = jnp.transpose(w2, (3, 2, 1, 0)).reshape(9 * C_mid, C_out)
    w2p = jnp.zeros((9 * C_mid, LANE), jnp.float32).at[:, :C_out].set(w2m)
    b2p = jnp.zeros((1, LANE), jnp.float32).at[:, :C_out].set(b2)

    kern = functools.partial(_down_kernel, S=S, KK=KK, N=N, C_mid=C_mid)
    out = pl.pallas_call(
        kern,
        out_shape=jax.ShapeDtypeStruct((M, LANE), jnp.float32),
        grid_spec=pltpu.PrefetchScalarGridSpec(
            num_scalar_prefetch=0,
            grid=(1,),          # single step: whole batch folded into M = N*S*S
            in_specs=[
                pl.BlockSpec((KK * N, S, S, C), lambda i: (0, 0, 0, 0)),
                pl.BlockSpec((9 * C, C_mid), lambda i: (0, 0)),
                pl.BlockSpec((1, C_mid), lambda i: (0, 0)),
                pl.BlockSpec((9 * C_mid, LANE), lambda i: (0, 0)),
                pl.BlockSpec((1, LANE), lambda i: (0, 0)),
            ],
            out_specs=pl.BlockSpec((M, LANE), lambda i: (0, 0)),
        ),
        compiler_params=pltpu.CompilerParams(
            dimension_semantics=("arbitrary",)),
    )(xg, w1m, b1m, w2p, b2p)

    # lane-dense (M, 128) -> NCHW with the real C_out channels
    y = out[:, :C_out].reshape(N, S, S, C_out)
    return jnp.transpose(y, (0, 3, 1, 2))


def ref_forward(x_nchw, params, S):
    # Pure-JAX reference matching the PyTorch module semantics.
    w1, b1, w2, b2 = params
    N, C, H, W = x_nchw.shape
    k = H // S
    p = x_nchw.reshape(N, C, S, k, S, k).max(axis=(3, 5))

    def block(x, w, b):
        xp = jnp.pad(x, ((0, 0), (0, 0), (1, 1), (1, 1)), mode="edge")
        y = jax.lax.conv_general_dilated(
            xp, w, window_strides=(1, 1), padding="VALID",
            dimension_numbers=("NCHW", "OIHW", "NCHW"),
            precision=jax.lax.Precision.HIGHEST)
        y = y + b[None, :, None, None]
        return jnp.where(y >= 0, y, NEG_SLOPE * y)

    return block(block(p, w1, b1), w2, b2)


if __name__ == "__main__":
    key = jax.random.PRNGKey(0)
    N, C_in, H, W = 2, 4, 16, 16
    C_out = 8          # out_channels (mid_channels defaults to out_channels)
    S = 8              # AdaptiveMaxPool2d target shape
    C_mid = C_out

    k_x, k_w1, k_b1, k_w2, k_b2 = jax.random.split(key, 5)
    x = jax.random.normal(k_x, (N, C_in, H, W), dtype=jnp.float32)

    # Deterministic parameter init (PyTorch-like uniform fan-in bounds).
    bound1 = 1.0 / np.sqrt(C_in * 9)
    w1 = jax.random.uniform(k_w1, (C_mid, C_in, 3, 3), jnp.float32, -bound1, bound1)
    b1 = jax.random.uniform(k_b1, (C_mid,), jnp.float32, -bound1, bound1)
    bound2 = 1.0 / np.sqrt(C_mid * 9)
    w2 = jax.random.uniform(k_w2, (C_out, C_mid, 3, 3), jnp.float32, -bound2, bound2)
    b2 = jax.random.uniform(k_b2, (C_out,), jnp.float32, -bound2, bound2)
    params = (w1, b1, w2, b2)

    out = down_forward(x, params, S)
    out = jax.block_until_ready(out)

    ref = ref_forward(x, params, S)
    np.testing.assert_allclose(np.asarray(out), np.asarray(ref),
                               rtol=1e-4, atol=1e-4)
    print("KERNEL_OK")
</pallas_src>

<mosaic_0001>
module attributes {stable_mosaic.version = 11 : i64} {
  func.func @_down_kernel(%arg0: i32, %arg1: memref<8x8x8x4xf32, #tpu.memory_space<vmem>>, %arg2: memref<36x8xf32, #tpu.memory_space<vmem>>, %arg3: memref<1x8xf32, #tpu.memory_space<vmem>>, %arg4: memref<72x128xf32, #tpu.memory_space<vmem>>, %arg5: memref<1x128xf32, #tpu.memory_space<vmem>>, %arg6: memref<128x128xf32, #tpu.memory_space<vmem>>) attributes {dimension_semantics = [#tpu.dimension_semantics<arbitrary>], iteration_bounds = array<i64: 1>, scalar_prefetch = 0 : i64, scratch_operands = 0 : i64, tpu.core_type = #tpu.core_type<tc>, window_params = [{pipeline_mode = #tpu.pipeline_mode<synchronous>, transform_indices = @transform_0, window_bounds = array<i64: 8, 8, 8, 4>}, {pipeline_mode = #tpu.pipeline_mode<synchronous>, transform_indices = @transform_1, window_bounds = array<i64: 36, 8>}, {pipeline_mode = #tpu.pipeline_mode<synchronous>, transform_indices = @transform_2, window_bounds = array<i64: 1, 8>}, {pipeline_mode = #tpu.pipeline_mode<synchronous>, transform_indices = @transform_3, window_bounds = array<i64: 72, 128>}, {pipeline_mode = #tpu.pipeline_mode<synchronous>, transform_indices = @transform_4, window_bounds = array<i64: 1, 128>}, {pipeline_mode = #tpu.pipeline_mode<synchronous>, transform_indices = @transform_5, window_bounds = array<i64: 128, 128>}]} {
    %c0 = arith.constant 0 : index
    %c0_0 = arith.constant 0 : index
    %c0_1 = arith.constant 0 : index
    %c0_2 = arith.constant 0 : index
    %0 = vector.load %arg1[%c0, %c0_0, %c0_1, %c0_2] : memref<8x8x8x4xf32, #tpu.memory_space<vmem>>, vector<2x8x8x4xf32>
    %c2 = arith.constant 2 : index
    %c0_3 = arith.constant 0 : index
    %c0_4 = arith.constant 0 : index
    %c0_5 = arith.constant 0 : index
    %1 = vector.load %arg1[%c2, %c0_3, %c0_4, %c0_5] : memref<8x8x8x4xf32, #tpu.memory_space<vmem>>, vector<2x8x8x4xf32>
    %2 = arith.maximumf %0, %1 : vector<2x8x8x4xf32>
    %c4 = arith.constant 4 : index
    %c0_6 = arith.constant 0 : index
    %c0_7 = arith.constant 0 : index
    %c0_8 = arith.constant 0 : index
    %3 = vector.load %arg1[%c4, %c0_6, %c0_7, %c0_8] : memref<8x8x8x4xf32, #tpu.memory_space<vmem>>, vector<2x8x8x4xf32>
    %4 = arith.maximumf %2, %3 : vector<2x8x8x4xf32>
    %c6 = arith.constant 6 : index
    %c0_9 = arith.constant 0 : index
    %c0_10 = arith.constant 0 : index
    %c0_11 = arith.constant 0 : index
    %5 = vector.load %arg1[%c6, %c0_9, %c0_10, %c0_11] : memref<8x8x8x4xf32, #tpu.memory_space<vmem>>, vector<2x8x8x4xf32>
    %6 = arith.maximumf %4, %5 : vector<2x8x8x4xf32>
    %7 = vector.extract_strided_slice %6 {offsets = [0, 0, 0, 0], sizes = [2, 1, 8, 4], strides = [1, 1, 1, 1]} : vector<2x8x8x4xf32> to vector<2x1x8x4xf32>
    %8 = vector.extract_strided_slice %6 {offsets = [0, 0, 0, 0], sizes = [2, 7, 8, 4], strides = [1, 1, 1, 1]} : vector<2x8x8x4xf32> to vector<2x7x8x4xf32>
    %9 = tpu.concatenate %7, %8 in 1 : vector<2x1x8x4xf32>, vector<2x7x8x4xf32> -> vector<2x8x8x4xf32>
    %10 = vector.extract_strided_slice %6 {offsets = [0, 1, 0, 0], sizes = [2, 7, 8, 4], strides = [1, 1, 1, 1]} : vector<2x8x8x4xf32> to vector<2x7x8x4xf32>
    %11 = vector.extract_strided_slice %6 {offsets = [0, 7, 0, 0], sizes = [2, 1, 8, 4], strides = [1, 1, 1, 1]} : vector<2x8x8x4xf32> to vector<2x1x8x4xf32>
    %12 = tpu.concatenate %10, %11 in 1 : vector<2x7x8x4xf32>, vector<2x1x8x4xf32> -> vector<2x8x8x4xf32>
    %13 = tpu.concatenate %9, %6, %12 in 3 : vector<2x8x8x4xf32>, vector<2x8x8x4xf32>, vector<2x8x8x4xf32> -> vector<2x8x8x12xf32>
    %14 = vector.extract_strided_slice %13 {offsets = [0, 0, 0, 0], sizes = [2, 8, 1, 12], strides = [1, 1, 1, 1]} : vector<2x8x8x12xf32> to vector<2x8x1x12xf32>
    %15 = vector.extract_strided_slice %13 {offsets = [0, 0, 0, 0], sizes = [2, 8, 7, 12], strides = [1, 1, 1, 1]} : vector<2x8x8x12xf32> to vector<2x8x7x12xf32>
    %16 = tpu.concatenate %14, %15 in 2 : vector<2x8x1x12xf32>, vector<2x8x7x12xf32> -> vector<2x8x8x12xf32>
    %17 = vector.extract_strided_slice %13 {offsets = [0, 0, 1, 0], sizes = [2, 8, 7, 12], strides = [1, 1, 1, 1]} : vector<2x8x8x12xf32> to vector<2x8x7x12xf32>
    %18 = vector.extract_strided_slice %13 {offsets = [0, 0, 7, 0], sizes = [2, 8, 1, 12], strides = [1, 1, 1, 1]} : vector<2x8x8x12xf32> to vector<2x8x1x12xf32>
    %19 = tpu.concatenate %17, %18 in 2 : vector<2x8x7x12xf32>, vector<2x8x1x12xf32> -> vector<2x8x8x12xf32>
    %20 = tpu.concatenate %16, %13, %19 in 3 : vector<2x8x8x12xf32>, vector<2x8x8x12xf32>, vector<2x8x8x12xf32> -> vector<2x8x8x36xf32>
    %21 = vector.shape_cast %20 : vector<2x8x8x36xf32> to vector<128x36xf32>
    %c0_12 = arith.constant 0 : index
    %c0_13 = arith.constant 0 : index
    %22 = vector.load %arg2[%c0_12, %c0_13] : memref<36x8xf32, #tpu.memory_space<vmem>>, vector<36x8xf32>
    %cst = arith.constant dense<0.000000e+00> : vector<128x8xf32>
    %23 = tpu.matmul %21, %22, %cst {dimension_numbers = #tpu.dot_dimension_numbers<[1], [0], [0], [1], [0, 0, 1, 1], [], []>, precision = #tpu.contract_precision<fp32>} : vector<128x36xf32>, vector<36x8xf32>, vector<128x8xf32> -> vector<128x8xf32>
    %c0_14 = arith.constant 0 : index
    %c0_15 = arith.constant 0 : index
    %24 = vector.load %arg3[%c0_14, %c0_15] : memref<1x8xf32, #tpu.memory_space<vmem>>, vector<1x8xf32>
    %25 = vector.broadcast %24 : vector<1x8xf32> to vector<128x8xf32>
    %26 = arith.addf %23, %25 : vector<128x8xf32>
    %cst_16 = arith.constant 0.000000e+00 : f32
    %27 = vector.broadcast %cst_16 : f32 to vector<128x8xf32>
    %28 = arith.cmpf oge, %26, %27 : vector<128x8xf32>
    %cst_17 = arith.constant 0.00999999977 : f32
    %29 = vector.broadcast %cst_17 : f32 to vector<128x8xf32>
    %30 = arith.mulf %29, %26 : vector<128x8xf32>
    %31 = arith.select %28, %26, %30 : vector<128x8xi1>, vector<128x8xf32>
    %32 = vector.shape_cast %31 : vector<128x8xf32> to vector<2x8x8x8xf32>
    %33 = vector.extract_strided_slice %32 {offsets = [0, 0, 0, 0], sizes = [2, 1, 8, 8], strides = [1, 1, 1, 1]} : vector<2x8x8x8xf32> to vector<2x1x8x8xf32>
    %34 = vector.extract_strided_slice %32 {offsets = [0, 0, 0, 0], sizes = [2, 7, 8, 8], strides = [1, 1, 1, 1]} : vector<2x8x8x8xf32> to vector<2x7x8x8xf32>
    %35 = tpu.concatenate %33, %34 in 1 : vector<2x1x8x8xf32>, vector<2x7x8x8xf32> -> vector<2x8x8x8xf32>
    %36 = vector.extract_strided_slice %32 {offsets = [0, 1, 0, 0], sizes = [2, 7, 8, 8], strides = [1, 1, 1, 1]} : vector<2x8x8x8xf32> to vector<2x7x8x8xf32>
    %37 = vector.extract_strided_slice %32 {offsets = [0, 7, 0, 0], sizes = [2, 1, 8, 8], strides = [1, 1, 1, 1]} : vector<2x8x8x8xf32> to vector<2x1x8x8xf32>
    %38 = tpu.concatenate %36, %37 in 1 : vector<2x7x8x8xf32>, vector<2x1x8x8xf32> -> vector<2x8x8x8xf32>
    %39 = tpu.concatenate %35, %32, %38 in 3 : vector<2x8x8x8xf32>, vector<2x8x8x8xf32>, vector<2x8x8x8xf32> -> vector<2x8x8x24xf32>
    %40 = vector.extract_strided_slice %39 {offsets = [0, 0, 0, 0], sizes = [2, 8, 1, 24], strides = [1, 1, 1, 1]} : vector<2x8x8x24xf32> to vector<2x8x1x24xf32>
    %41 = vector.extract_strided_slice %39 {offsets = [0, 0, 0, 0], sizes = [2, 8, 7, 24], strides = [1, 1, 1, 1]} : vector<2x8x8x24xf32> to vector<2x8x7x24xf32>
    %42 = tpu.concatenate %40, %41 in 2 : vector<2x8x1x24xf32>, vector<2x8x7x24xf32> -> vector<2x8x8x24xf32>
    %43 = vector.extract_strided_slice %39 {offsets = [0, 0, 1, 0], sizes = [2, 8, 7, 24], strides = [1, 1, 1, 1]} : vector<2x8x8x24xf32> to vector<2x8x7x24xf32>
    %44 = vector.extract_strided_slice %39 {offsets = [0, 0, 7, 0], sizes = [2, 8, 1, 24], strides = [1, 1, 1, 1]} : vector<2x8x8x24xf32> to vector<2x8x1x24xf32>
    %45 = tpu.concatenate %43, %44 in 2 : vector<2x8x7x24xf32>, vector<2x8x1x24xf32> -> vector<2x8x8x24xf32>
    %46 = tpu.concatenate %42, %39, %45 in 3 : vector<2x8x8x24xf32>, vector<2x8x8x24xf32>, vector<2x8x8x24xf32> -> vector<2x8x8x72xf32>
    %47 = vector.shape_cast %46 : vector<2x8x8x72xf32> to vector<128x72xf32>
    %c0_18 = arith.constant 0 : index
    %c0_19 = arith.constant 0 : index
    %48 = vector.load %arg4[%c0_18, %c0_19] : memref<72x128xf32, #tpu.memory_space<vmem>>, vector<72x128xf32>
    %cst_20 = arith.constant dense<0.000000e+00> : vector<128x128xf32>
    %49 = tpu.matmul %47, %48, %cst_20 {dimension_numbers = #tpu.dot_dimension_numbers<[1], [0], [0], [1], [0, 0, 1, 1], [], []>, precision = #tpu.contract_precision<fp32>} : vector<128x72xf32>, vector<72x128xf32>, vector<128x128xf32> -> vector<128x128xf32>
    %c0_21 = arith.constant 0 : index
    %c0_22 = arith.constant 0 : index
    %50 = vector.load %arg5[%c0_21, %c0_22] : memref<1x128xf32, #tpu.memory_space<vmem>>, vector<1x128xf32>
    %51 = vector.broadcast %50 : vector<1x128xf32> to vector<128x128xf32>
    %52 = arith.addf %49, %51 : vector<128x128xf32>
    %cst_23 = arith.constant 0.000000e+00 : f32
    %53 = vector.broadcast %cst_23 : f32 to vector<128x128xf32>
    %54 = arith.cmpf oge, %52, %53 : vector<128x128xf32>
    %cst_24 = arith.constant 0.00999999977 : f32
    %55 = vector.broadcast %cst_24 : f32 to vector<128x128xf32>
    %56 = arith.mulf %55, %52 : vector<128x128xf32>
    %57 = arith.select %54, %52, %56 : vector<128x128xi1>, vector<128x128xf32>
    %c0_25 = arith.constant 0 : index
    %c0_26 = arith.constant 0 : index
    %58 = vector.load %arg6[%c0_25, %c0_26] : memref<128x128xf32, #tpu.memory_space<vmem>>, vector<128x128xf32>
    tpu.vector_store %arg6[%c0_25, %c0_26], %57 {strides = array<i32>} : memref<128x128xf32, #tpu.memory_space<vmem>>, vector<128x128xf32>,
    return
  }
  func.func @transform_0(%arg0: i32) -> (i32, i32, i32, i32) {
    %c0_i32 = arith.constant 0 : i32
    %c0_i32_0 = arith.constant 0 : i32
    %c0_i32_1 = arith.constant 0 : i32
    %c0_i32_2 = arith.constant 0 : i32
    %c0_i32_3 = arith.constant 0 : i32
    return %c0_i32, %c0_i32_0, %c0_i32_1, %c0_i32_2 : i32, i32, i32, i32
  }
  func.func @transform_1(%arg0: i32) -> (i32, i32) {
    %c0_i32 = arith.constant 0 : i32
    %c0_i32_0 = arith.constant 0 : i32
    %c0_i32_1 = arith.constant 0 : i32
    return %c0_i32, %c0_i32_0 : i32, i32
  }
  func.func @transform_2(%arg0: i32) -> (i32, i32) {
    %c0_i32 = arith.constant 0 : i32
    %c0_i32_0 = arith.constant 0 : i32
    %c0_i32_1 = arith.constant 0 : i32
    return %c0_i32, %c0_i32_0 : i32, i32
  }
  func.func @transform_3(%arg0: i32) -> (i32, i32) {
    %c0_i32 = arith.constant 0 : i32
    %c0_i32_0 = arith.constant 0 : i32
    %c0_i32_1 = arith.constant 0 : i32
    return %c0_i32, %c0_i32_0 : i32, i32
  }
  func.func @transform_4(%arg0: i32) -> (i32, i32) {
    %c0_i32 = arith.constant 0 : i32
    %c0_i32_0 = arith.constant 0 : i32
    %c0_i32_1 = arith.constant 0 : i32
    return %c0_i32, %c0_i32_0 : i32, i32
  }
  func.func @transform_5(%arg0: i32) -> (i32, i32) {
    %c0_i32 = arith.constant 0 : i32
    %c0_i32_0 = arith.constant 0 : i32
    %c0_i32_1 = arith.constant 0 : i32
    return %c0_i32, %c0_i32_0 : i32, i32
  }
}

</mosaic_0001>

<bundles_post_ra>
// kernel: tpu_custom_call.1
= control target key start
LH: loop header
LB: loop body
LE: loop exit
PB: predicated region body
PF: predicated region fallthrough
CT: control target
= control target key end

     0   :  { %s4340_s27 = smov 8   ;;  %s4341_s30 = smov 4   ;;  %s6454_s0 = inlined_call_operand.vmem [shape: f32[8,8,8,4], index: 0, kind: input, shape index: {}]   ;;  %s6455_s1 = inlined_call_operand.vmem [shape: f32[36,8], index: 1, kind: input, shape index: {}]   ;;  %s6456_s2 = inlined_call_operand.vmem [shape: f32[1,8], index: 2, kind: input, shape index: {}]   ;;  %s6457_s3 = inlined_call_operand.vmem [shape: f32[72,128], index: 3, kind: input, shape index: {}]   ;;  %s6458_s4 = inlined_call_operand.vmem [shape: f32[1,128], index: 4, kind: input, shape index: {}]   ;;  %s6459_s5 = inlined_call_operand.hbm [shape: f32[128,128], index: 5, kind: output, shape index: {}]  }
   0x1   :  { %v22_v0 = vld [vmem:[%s6454_s0 + $0x8] sm:$0xff]  ;;  %v21_v4 = vld [vmem:[%s6454_s0] sm:$0xff]  ;;  %v23_v9 = vld [vmem:[%s6454_s0 + $0x10] sm:$0xff] }
   0x2   :  { %v3529_v1 = vld [vmem:[%s6454_s0 + $0x88] sm:$0xff]  ;;  %v3528_v5 = vld [vmem:[%s6454_s0 + $0x80] sm:$0xff]  ;;  %v3530_v12 = vld [vmem:[%s6454_s0 + $0x90] sm:$0xff] }
   0x3   :  { %v3545_v2 = vld [vmem:[%s6454_s0 + $0x108] sm:$0xff]  ;;  %v55_v3 = vmax.f32 %v22_v0, %v3529_v1  ;;  %v54_v7 = vmax.f32 %v21_v4, %v3528_v5  ;;  %v3544_v8 = vld [vmem:[%s6454_s0 + $0x100] sm:$0xff]  ;;  %v3546_v13 = vld [vmem:[%s6454_s0 + $0x110] sm:$0xff]  ;;  %v56_v15 = vmax.f32 %v23_v9, %v3530_v12 }
   0x4   :  { %v3561_v6 = vld [vmem:[%s6454_s0 + $0x188] sm:$0xff]  ;;  %v3560_v11 = vld [vmem:[%s6454_s0 + $0x180] sm:$0xff]  ;;  %v24_v16 = vld [vmem:[%s6454_s0 + $0x18] sm:$0xff] }
   0x5   :  { %v88_v10 = vmax.f32 %v55_v3, %v3545_v2  ;;  %v87_v14 = vmax.f32 %v54_v7, %v3544_v8  ;;  %v3531_v17 = vld [vmem:[%s6454_s0 + $0x98] sm:$0xff]  ;;  %v3562_v20 = vld [vmem:[%s6454_s0 + $0x190] sm:$0xff]  ;;  %v25_v22 = vld [vmem:[%s6454_s0 + $0x20] sm:$0xff]  ;;  %v89_v25 = vmax.f32 %v56_v15, %v3546_v13 }
   0x6   :  { %v3547_v18 = vld [vmem:[%s6454_s0 + $0x118] sm:$0xff]  ;;  %v57_v21 = vmax.f32 %v24_v16, %v3531_v17  ;;  %v3532_v23 = vld [vmem:[%s6454_s0 + $0xa0] sm:$0xff]  ;;  %v26_v31 = vld [vmem:[%s6454_s0 + $0x28] sm:$0xff] }
   0x7   :  { %v4420_v19 = vmax.f32 %v88_v10, %v3561_v6  ;;  %v4431_v24 = vmax.f32 %v87_v14, %v3560_v11  ;;  %v3563_v27 = vld [vmem:[%s6454_s0 + $0x198] sm:$0xff]  ;;  %v58_v28 = vmax.f32 %v25_v22, %v3532_v23  ;;  %v4440_v29 = vmax.f32 %v89_v25, %v3562_v20  ;;  %v3548_v30 = vld [vmem:[%s6454_s0 + $0x120] sm:$0xff]  ;;  %v3533_v32 = vld [vmem:[%s6454_s0 + $0xa8] sm:$0xff] }
   0x8   :  { %v90_v26 = vmax.f32 %v57_v21, %v3547_v18  ;;  %v3564_v35 = vld [vmem:[%s6454_s0 + $0x1a0] sm:$0xff]  ;;  %v59_v36 = vmax.f32 %v26_v31, %v3533_v32  ;;  %v3549_v37 = vld [vmem:[%s6454_s0 + $0x128] sm:$0xff]  ;;  %v27_v38 = vld [vmem:[%s6454_s0 + $0x30] sm:$0xff] }
   0x9   :  { %200 = vrot.lane.b32.xlu1 %v4420_v19, %s4340_s27  ;;  %152 = vrot.lane.b32.xlu0 %v4431_v24, %s4341_s30  ;;  %v91_v34 = vmax.f32 %v58_v28, %v3548_v30  ;;  %v3534_v39 = vld [vmem:[%s6454_s0 + $0xb0] sm:$0xff]  ;;  %v3565_v42 = vld [vmem:[%s6454_s0 + $0x1a8] sm:$0xff] }
   0xa   :  { %v4453_v33 = vmax.f32 %v90_v26, %v3563_v27  ;;  %v92_v41 = vmax.f32 %v59_v36, %v3549_v37  ;;  %v60_v43 = vmax.f32 %v27_v38, %v3534_v39  ;;  %v3550_v44 = vld [vmem:[%s6454_s0 + $0x130] sm:$0xff]  ;;  %v28_v45 = vld [vmem:[%s6454_s0 + $0x38] sm:$0xff]  ;;  %v29_v52 = vld [vmem:[%s6454_s0 + $0x40] sm:$0xff] }
   0xb   :  { %v4471_v40 = vmax.f32 %v91_v34, %v3564_v35  ;;  %v3535_v46 = vld [vmem:[%s6454_s0 + $0xb8] sm:$0xff]  ;;  %v3566_v49 = vld [vmem:[%s6454_s0 + $0x1b0] sm:$0xff]  ;;  %v3536_v53 = vld [vmem:[%s6454_s0 + $0xc0] sm:$0xff] }
   0xc   :  { %v4489_v47 = vmax.f32 %v92_v41, %v3565_v42  ;;  %v93_v48 = vmax.f32 %v60_v43, %v3550_v44  ;;  %v61_v50 = vmax.f32 %v28_v45, %v3535_v46  ;;  %v3551_v51 = vld [vmem:[%s6454_s0 + $0x138] sm:$0xff] }
   0xd   :  { %202 = vrot.lane.b32.xlu1 %v4440_v29, %s4340_s27  ;;  %154 = vrot.lane.b32.xlu0 %v4420_v19, %s4341_s30 }
  0x11   :  { %158 = vrot.lane.b32.xlu1 %v4453_v33, %s4341_s30  ;;  %156 = vrot.lane.b32.xlu0 %v4440_v29, %s4341_s30 }
  0x15   :  { %206 = vrot.lane.b32.xlu1 %v4471_v40, %s4340_s27  ;;  %204 = vrot.lane.b32.xlu0 %v4453_v33, %s4340_s27 }
  0x16   :  { %10 = vsyncpa [#allocation3], 0  ;;  %v4507_v54 = vmax.f32 %v93_v48, %v3566_v49  ;;  %v94_v55 = vmax.f32 %v61_v50, %v3551_v51  ;;  %v3567_v56 = vld [vmem:[%s6454_s0 + $0x1b8] sm:$0xff]  ;;  %v62_v57 = vmax.f32 %v29_v52, %v3536_v53  ;;  %v3552_v58 = vld [vmem:[%s6454_s0 + $0x140] sm:$0xff]  ;;  %vm242_vm0 = vcmask 31744  }
  0x17   :  { %v30_v59 = vld [vmem:[%s6454_s0 + $0x48] sm:$0xff]  ;;  %v3568_v63 = vld [vmem:[%s6454_s0 + $0x1c0] sm:$0xff]  ;;  %v31_v2 = vld [vmem:[%s6454_s0 + $0x50] sm:$0xff]  ;;  %vm259_vm1 = vcmask 64512   ;;  %vm597_vm2 = vcmask 1043456   ;;  %vm373_vm3 = vcmask 1046528  }
  0x18   :  { %v3537_v60 = vld [vmem:[%s6454_s0 + $0xc8] sm:$0xff]  ;;  %v127_v61 = vmax.f32 %v94_v55, %v3567_v56  ;;  %v95_v62 = vmax.f32 %v62_v57, %v3552_v58  ;;  %v3538_v3 = vld [vmem:[%s6454_s0 + $0xd0] sm:$0xff]  ;;  %v32_v9 = vld [vmem:[%s6454_s0 + $0x58] sm:$0xff]  ;;  %vm324_vm4 = vcmask 1040384   ;;  %vm502_vm5 = vcmask 97280  }
  0x19   :  { %162 = vrot.lane.b32.xlu1 %v4489_v47, %s4341_s30  ;;  %160 = vrot.lane.b32.xlu0 %v4471_v40, %s4341_s30  ;;  %v63_v0 = vmax.f32 %v30_v59, %v3537_v60  ;;  %v3553_v1 = vld [vmem:[%s6454_s0 + $0x148] sm:$0xff]  ;;  %v64_v7 = vmax.f32 %v31_v2, %v3538_v3  ;;  %v3554_v8 = vld [vmem:[%s6454_s0 + $0x150] sm:$0xff]  ;;  %vm519_vm6 = vcmask 195584   ;;  %vm548_vm7 = vcmask 293888  }
  0x1a   :  { %v4540_v4 = vmax.f32 %v95_v62, %v3568_v63  ;;  %v3569_v6 = vld [vmem:[%s6454_s0 + $0x1c8] sm:$0xff]  ;;  %v3539_v10 = vld [vmem:[%s6454_s0 + $0xd8] sm:$0xff]  ;;  %v3570_v13 = vld [vmem:[%s6454_s0 + $0x1d0] sm:$0xff] }
  0x1b   :  { %v96_v5 = vmax.f32 %v63_v0, %v3553_v1  ;;  %v97_v12 = vmax.f32 %v64_v7, %v3554_v8  ;;  %v65_v14 = vmax.f32 %v32_v9, %v3539_v10  ;;  %v3555_v15 = vld [vmem:[%s6454_s0 + $0x158] sm:$0xff]  ;;  %v33_v16 = vld [vmem:[%s6454_s0 + $0x60] sm:$0xff]  ;;  %v34_v25 = vld [vmem:[%s6454_s0 + $0x68] sm:$0xff] }
  0x1c   :  { %v3540_v17 = vld [vmem:[%s6454_s0 + $0xe0] sm:$0xff]  ;;  %v3571_v21 = vld [vmem:[%s6454_s0 + $0x1d8] sm:$0xff]  ;;  %v3541_v26 = vld [vmem:[%s6454_s0 + $0xe8] sm:$0xff] }
  0x1d   :  { %210 = vrot.lane.b32.xlu1 %v4507_v54, %s4340_s27  ;;  %208 = vrot.lane.b32.xlu0 %v4489_v47, %s4340_s27  ;;  %v4558_v11 = vmax.f32 %v96_v5, %v3569_v6  ;;  %v4575_v18 = vmax.f32 %v97_v12, %v3570_v13  ;;  %v98_v20 = vmax.f32 %v65_v14, %v3555_v15  ;;  %v3556_v23 = vld [vmem:[%s6454_s0 + $0x160] sm:$0xff]  ;;  %v3557_v32 = vld [vmem:[%s6454_s0 + $0x168] sm:$0xff] }
  0x1e   :  { %v66_v22 = vmax.f32 %v33_v16, %v3540_v17  ;;  %v3572_v30 = vld [vmem:[%s6454_s0 + $0x1e0] sm:$0xff]  ;;  %v67_v31 = vmax.f32 %v34_v25, %v3541_v26  ;;  %v35_v34 = vld [vmem:[%s6454_s0 + $0x70] sm:$0xff]  ;;  %v3573_v38 = vld [vmem:[%s6454_s0 + $0x1e8] sm:$0xff] }
  0x1f   :  { %v4593_v27 = vmax.f32 %v98_v20, %v3571_v21  ;;  %v3542_v35 = vld [vmem:[%s6454_s0 + $0xf0] sm:$0xff]  ;;  %v36_v42 = vld [vmem:[%s6454_s0 + $0x78] sm:$0xff]  ;;  %v540_v25 = vld [vmem:[%s6455_s1 + $0x20] sm:$0xf] }
  0x20   :  { %v99_v28 = vmax.f32 %v66_v22, %v3556_v23  ;;  %v100_v37 = vmax.f32 %v67_v31, %v3557_v32  ;;  %v68_v39 = vmax.f32 %v35_v34, %v3542_v35  ;;  %v3558_v41 = vld [vmem:[%s6454_s0 + $0x170] sm:$0xff]  ;;  %v3543_v43 = vld [vmem:[%s6454_s0 + $0xf8] sm:$0xff] }
  0x21   :  { %166 = vrot.lane.b32.xlu1 %v127_v61, %s4341_s30  ;;  %164 = vrot.lane.b32.xlu0 %v4507_v54, %s4341_s30  ;;  %v69_v46 = vmax.f32 %v36_v42, %v3543_v43  ;;  %v3574_v48 = vld [vmem:[%s6454_s0 + $0x1f0] sm:$0xff]  ;;  %v3559_v49 = vld [vmem:[%s6454_s0 + $0x178] sm:$0xff] }
  0x22   :  { %v4611_v36 = vmax.f32 %v99_v28, %v3572_v30  ;;  %v4629_v44 = vmax.f32 %v100_v37, %v3573_v38  ;;  %v101_v45 = vmax.f32 %v68_v39, %v3558_v41  ;;  %v3575_v52 = vld [vmem:[%s6454_s0 + $0x1f8] sm:$0xff]  ;;  %s4342_s0 = smov 12   ;;  %v599_v28 = vsel %vm597_vm2, %v540_v25, 0 }
  0x23   :  { %v102_v51 = vmax.f32 %v69_v46, %v3559_v49  ;;  %v4722_v32 = vand.u32 4294901760, %v599_v28  ;;  %v539_v34 = vld [vmem:[%s6455_s1 + $0x18] sm:$0xff]  ;;  %v537_v49 = vld [vmem:[%s6455_s1 + $0x8] sm:$0xff] }
  0x24   :  { %v4641_v50 = vmax.f32 %v101_v45, %v3574_v48  ;;  %v4730_v37 = vand.u32 4294901760, %v539_v34 }
  0x25   :  { %168 = vrot.lane.b32.xlu1 %v4540_v4, %s4341_s30  ;;  %212 = vrot.lane.b32.xlu0 %v127_v61, %s4340_s27  ;;  %v135_v53 = vmax.f32 %v102_v51, %v3575_v52  ;;  %v4735_v38 = vsub.f32 %v599_v28, %v4722_v32 }
  0x26   :  { %3854 = vmatprep.subr.mxu0 %v4722_v32  ;;  %v4744_v42 = vsub.f32 %v539_v34, %v4730_v37 }
  0x27   :  { %3855 = vmatpush3.msra.mxu0 %v4722_v32  ;;  %v4753_v48 = vand.u32 4294901760, %v4735_v38 }
  0x28   :  { %3856 = vmatprep.subr.mxu0 %v4730_v37 }
  0x29   :  { %214 = vrot.lane.b32.xlu1 %v4558_v11, %s4340_s27  ;;  %170 = vrot.lane.b32.xlu0 %v4558_v11, %s4341_s30  ;;  %v857_v51 = vsub.f32 %v4735_v38, %v4753_v48 }
  0x2a   :  { %3857 = vmatpush3.msra.mxu0 %v4730_v37 }
  0x2d   :  { %172 = vrot.lane.b32.xlu1 %v4575_v18, %s4341_s30  ;;  %216 = vrot.lane.b32.xlu0 %v4575_v18, %s4340_s27 }
  0x31   :  { %218 = vrot.lane.b32.xlu1 %v4593_v27, %s4340_s27  ;;  %174 = vrot.lane.b32.xlu0 %v4593_v27, %s4341_s30 }
  0x35   :  { %176 = vrot.lane.b32.xlu1 %v4611_v36, %s4341_s30  ;;  %220 = vrot.lane.b32.xlu0 %v4611_v36, %s4340_s27 }
  0x39   :  { %222 = vrot.lane.b32.xlu1 %v4629_v44, %s4340_s27  ;;  %178 = vrot.lane.b32.xlu0 %v4629_v44, %s4341_s30 }
  0x3d   :  { %180 = vrot.lane.b32.xlu1 %v4641_v50, %s4341_s30  ;;  %224 = vrot.lane.b32.xlu0 %v4641_v50, %s4340_s27 }
  0x41   :  { %226 = vrot.lane.b32.xlu1 %v135_v53, %s4340_s27  ;;  %182 = vrot.lane.b32.xlu0 %v135_v53, %s4341_s30  ;;  %v4770_v53 = vand.u32 4294901760, %v537_v49 }
  0x7b   :  { %v201_v55 = vpop.permute.xlu1 %200  ;;  %v153_v56 = vpop.permute.xlu0 %152 }
  0x7c   :  { %v243_v57 = vsel %vm242_vm0, %v4431_v24, %v153_v56 }
  0x7d   :  { %v4657_v58 = vsel %vm259_vm1, %v243_v57, %v201_v55  ;;  %v536_v55 = vld [vmem:[%s6455_s1] sm:$0xff] }
  0x7e   :  { %390 = vrot.lane.b32.xlu0 %v4657_v58, %s4342_s0 }
  0x7f   :  { %v203_v59 = vpop.permute.xlu1 %202  ;;  %v155_v60 = vpop.permute.xlu0 %154 }
  0x80   :  { %v244_v61 = vsel %vm242_vm0, %v4431_v24, %v155_v60 }
  0x81   :  { %v4664_v62 = vsel %vm259_vm1, %v244_v61, %v203_v59  ;;  %v4778_v59 = vand.u32 4294901760, %v536_v55 }
  0x82   :  { %392 = vrot.lane.b32.xlu1 %v4664_v62, %s4342_s0 }
  0x83   :  { %v159_v63 = vpop.permute.xlu1 %158  ;;  %v157_v0 = vpop.permute.xlu0 %156 }
  0x84   :  { %v246_v1 = vsel %vm242_vm0, %v4440_v29, %v159_v63  ;;  %v245_v3 = vsel %vm242_vm0, %v4420_v19, %v157_v0  ;;  %v858_v63 = vand.u32 4294901760, %v857_v51 }
  0x86   :  { %3888 = vmatprep.subr.mxu1 %v858_v63 }
  0x87   :  { %v207_v2 = vpop.permute.xlu1 %206  ;;  %v205_v6 = vpop.permute.xlu0 %204  ;;  %3889 = vmatpush3.msra.mxu1 %v858_v63 }
  0x88   :  { %v4673_v5 = vsel %vm259_vm1, %v246_v1, %v207_v2  ;;  %v4676_v24 = vsel %vm259_vm1, %v245_v3, %v205_v6  ;;  %v4787_v1 = vsub.f32 %v537_v49, %v4770_v53  ;;  %v4794_v6 = vsub.f32 %v536_v55, %v4778_v59 }
  0x89   :  { %396 = vrot.lane.b32.xlu1 %v4673_v5, %s4342_s0  ;;  %394 = vrot.lane.b32.xlu0 %v4676_v24, %s4342_s0 }
  0x8b   :  { %v163_v7 = vpop.permute.xlu1 %162  ;;  %v161_v8 = vpop.permute.xlu0 %160 }
  0x8c   :  { %v248_v29 = vsel %vm242_vm0, %v4471_v40, %v163_v7  ;;  %v247_v19 = vsel %vm242_vm0, %v4453_v33, %v161_v8 }
  0x8f   :  { %v211_v9 = vpop.permute.xlu1 %210  ;;  %v209_v12 = vpop.permute.xlu0 %208 }
  0x90   :  { %v4687_v10 = vsel %vm259_vm1, %v248_v29, %v211_v9  ;;  %v4690_v13 = vsel %vm259_vm1, %v247_v19, %v209_v12  ;;  %v4804_v29 = vand.u32 4294901760, %v4787_v1  ;;  %v4807_v9 = vand.u32 4294901760, %v4794_v6 }
  0x91   :  { %400 = vrot.lane.b32.xlu1 %v4687_v10, %s4342_s0  ;;  %398 = vrot.lane.b32.xlu0 %v4690_v13, %s4342_s0  ;;  %v346_v51 = vrot.slane %v4687_v10, 1 }
  0x93   :  { %v167_v14 = vpop.permute.xlu1 %166  ;;  %v165_v15 = vpop.permute.xlu0 %164 }
  0x94   :  { %v250_v16 = vsel %vm242_vm0, %v4507_v54, %v167_v14  ;;  %v249_v33 = vsel %vm242_vm0, %v4489_v47, %v165_v15  ;;  %v885_v15 = vsub.f32 %v4794_v6, %v4807_v9 }
  0x97   :  { %v169_v40 = vpop.permute.xlu1 %168  ;;  %v213_v17 = vpop.permute.xlu0 %212 }
  0x98   :  { %v4701_v20 = vsel %vm259_vm1, %v249_v33, %v213_v17  ;;  %v4704_v21 = vsel %vm259_vm1, %v250_v16, %v213_v17  ;;  %v251_v22 = vsel %vm242_vm0, %v4540_v4, %v169_v40 }
  0x99   :  { %404 = vrot.lane.b32.xlu1 %v4704_v21, %s4342_s0  ;;  %402 = vrot.lane.b32.xlu0 %v4701_v20, %s4342_s0 }
  0x9b   :  { %v215_v54 = vpop.permute.xlu1 %214  ;;  %v171_v47 = vpop.permute.xlu0 %170 }
  0x9c   :  { %v4713_v23 = vsel %vm259_vm1, %v251_v22, %v215_v54  ;;  %v252_v30 = vsel %vm242_vm0, %v4540_v4, %v171_v47  ;;  %v538_v4 = vld [vmem:[%s6455_s1 + $0x10] sm:$0xff]  ;;  %v886_v22 = vand.u32 4294901760, %v885_v15  ;;  %s4343_s1 = smov 24  }
  0x9d   :  { %406 = vrot.lane.b32.xlu0 %v4713_v23, %s4342_s0  ;;  %v4746_v43 = vand.u32 4294901760, %v538_v4  ;;  %v349_v63 = vrot.slane %v4713_v23, 1 }
  0x9f   :  { %v173_v26 = vpop.permute.xlu1 %172  ;;  %v217_v31 = vpop.permute.xlu0 %216  ;;  %v4768_v52 = vsub.f32 %v538_v4, %v4746_v43  ;;  %3858 = vmatprep.subr.mxu0 %v4746_v43  ;;  %v343_v4 = vrot.slane %v4676_v24, 1 }
  0xa0   :  { %v4728_v35 = vsel %vm259_vm1, %v252_v30, %v217_v31  ;;  %v253_v39 = vsel %vm242_vm0, %v4558_v11, %v173_v26  ;;  %v4762_v11 = vand.u32 4294901760, %v4744_v42  ;;  %3859 = vmatpush3.msra.mxu0 %v4746_v43  ;;  %v342_v31 = vrot.slane %v4664_v62, 1 }
  0xa1   :  { %408 = vrot.lane.b32.xlu1 %v4728_v35, %s4342_s0  ;;  %v4784_v0 = vand.u32 4294901760, %v4768_v52  ;;  %3860 = vmatprep.subr.mxu0 %v4770_v53 }
  0xa2   :  { %v864_v57 = vsub.f32 %v4744_v42, %v4762_v11  ;;  %3861 = vmatpush3.msra.mxu0 %v4770_v53 }
  0xa3   :  { %v219_v41 = vpop.permute.xlu1 %218  ;;  %v175_v46 = vpop.permute.xlu0 %174  ;;  %3862 = vmatprep.subr.mxu0 %v4778_v59 }
  0xa4   :  { %v4750_v45 = vsel %vm259_vm1, %v253_v39, %v219_v41  ;;  %v254_v60 = vsel %vm242_vm0, %v4575_v18, %v175_v46  ;;  %v865_v3 = vand.u32 4294901760, %v864_v57  ;;  %v871_v18 = vsub.f32 %v4768_v52, %v4784_v0  ;;  %3863 = vmatpush3.msra.mxu0 %v4778_v59 }
  0xa5   :  { %410 = vrot.lane.b32.xlu0 %v4750_v45, %s4342_s0  ;;  %3922 = vmatprep.subr.mxu0 %v4735_v38  ;;  %v344_v39 = vrot.slane %v4673_v5, 1  ;;  %v376_v41 = vsel %vm373_vm3, %v343_v4, %v4676_v24  ;;  %v345_v46 = vrot.slane %v4690_v13, 1  ;;  %v379_v57 = vsel %vm373_vm3, %v346_v51, %v4687_v10 }
  0xa6   :  { %3890 = vmatprep.subr.mxu1 %v865_v3  ;;  %v872_v14 = vand.u32 4294901760, %v871_v18  ;;  %v350_v18 = vrot.slane %v4728_v35, 1 }
  0xa7   :  { %v177_v56 = vpop.permute.xlu1 %176  ;;  %v221_v61 = vpop.permute.xlu0 %220  ;;  %3891 = vmatpush3.msra.mxu1 %v865_v3  ;;  %v377_v49 = vsel %vm373_vm3, %v344_v39, %v4673_v5  ;;  %v378_v55 = vsel %vm373_vm3, %v345_v46, %v4690_v13 }
  0xa8   :  { %v4791_v2 = vsel %vm259_vm1, %v254_v60, %v221_v61  ;;  %v255_v7 = vsel %vm242_vm0, %v4593_v27, %v177_v56  ;;  %v878_v27 = vsub.f32 %v4787_v1, %v4804_v29  ;;  %3892 = vmatprep.subr.mxu1 %v872_v14  ;;  %v347_v56 = vrot.slane %v4701_v20, 1 }
  0xa9   :  { %412 = vrot.lane.b32.xlu1 %v4791_v2, %s4342_s0  ;;  %3893 = vmatpush3.msra.mxu1 %v872_v14  ;;  %v348_v60 = vrot.slane %v4704_v21, 1  ;;  %v352_v14 = vrot.slane %v4791_v2, 1 }
  0xaa   :  { %v879_v16 = vand.u32 4294901760, %v878_v27  ;;  %v380_v61 = vsel %vm373_vm3, %v347_v56, %v4701_v20 }
  0xab   :  { %v223_v8 = vpop.permute.xlu1 %222  ;;  %v179_v12 = vpop.permute.xlu0 %178  ;;  %v381_v3 = vsel %vm373_vm3, %v348_v60, %v4704_v21  ;;  %v292_v60 = vrot.slane %v4657_v58, 7 }
  0xac   :  { %v4811_v19 = vsel %vm259_vm1, %v255_v7, %v223_v8  ;;  %v256_v33 = vsel %vm242_vm0, %v4611_v36, %v179_v12  ;;  %3894 = vmatprep.subr.mxu1 %v879_v16  ;;  %v341_v36 = vrot.slane %v4657_v58, 1  ;;  %v382_v7 = vsel %vm373_vm3, %v349_v63, %v4713_v23 }
  0xad   :  { %414 = vrot.lane.b32.xlu0 %v4811_v19, %s4342_s0  ;;  %3895 = vmatpush3.msra.mxu1 %v879_v16  ;;  %v351_v8 = vrot.slane %v4750_v45, 1  ;;  %v383_v12 = vsel %vm373_vm3, %v350_v18, %v4728_v35  ;;  %v353_v15 = vrot.slane %v4811_v19, 1  ;;  %v295_v63 = vrot.slane %v4673_v5, 7 }
  0xae   :  { %3896 = vmatprep.subr.mxu1 %v886_v22  ;;  %v374_v34 = vsel %vm373_vm3, %v341_v36, %v4657_v58  ;;  %v297_v18 = vrot.slane %v4687_v10, 7 }
  0xaf   :  { %v181_v40 = vpop.permute.xlu1 %180  ;;  %v225_v17 = vpop.permute.xlu0 %224  ;;  %3897 = vmatpush3.msra.mxu1 %v886_v22  ;;  %v384_v27 = vsel %vm373_vm3, %v351_v8, %v4750_v45 }
  0xb0   :  { %v4824_v54 = vsel %vm259_vm1, %v256_v33, %v225_v17  ;;  %v257_v47 = vsel %vm242_vm0, %v4629_v44, %v181_v40  ;;  %3956 = vmatprep.subr.mxu1 %v4722_v32  ;;  %v385_v40 = vsel %vm373_vm3, %v352_v14, %v4791_v2  ;;  %v386_v33 = vsel %vm373_vm3, %v353_v15, %v4811_v19 }
  0xb1   :  { %416 = vrot.lane.b32.xlu1 %v4824_v54, %s4342_s0  ;;  %v354_v16 = vrot.slane %v4824_v54, 1  ;;  %v298_v14 = vrot.slane %v4701_v20, 7  ;;  %v325_v15 = vsel %vm324_vm4, %v4657_v58, %v292_v60  ;;  %v330_v58 = vsel %vm324_vm4, %v4687_v10, %v297_v18 }
  0xb2   :  { %v303_v60 = vrot.slane %v4791_v2, 7 }
  0xb3   :  { %v227_v25 = vpop.permute.xlu1 %226  ;;  %v183_v28 = vpop.permute.xlu0 %182  ;;  %v387_v22 = vsel %vm373_vm3, %v354_v16, %v4824_v54 }
  0xb4   :  { %v4831_v26 = vsel %vm259_vm1, %v257_v47, %v227_v25  ;;  %v258_v30 = vsel %vm242_vm0, %v4641_v50, %v183_v28  ;;  %v375_v50 = vsel %vm373_vm3, %v342_v31, %v4664_v62 }
  0xb5   :  { %418 = vrot.lane.b32.xlu0 %v4831_v26, %s4342_s0  ;;  %v4840_v44 = vsel %vm259_vm1, %v258_v30, %v227_v25  ;;  %v355_v17 = vrot.slane %v4831_v26, 1 }
  0xb6   :  { %420 = vrot.lane.b32.xlu1 %v4840_v44, %s4342_s0  ;;  %v356_v47 = vrot.slane %v4840_v44, 1 }
  0xb7   :  { %v388_v25 = vsel %vm373_vm3, %v355_v17, %v4831_v26  ;;  %v302_v17 = vrot.slane %v4750_v45, 7 }
  0xb8   :  { %v389_v28 = vsel %vm373_vm3, %v356_v47, %v4840_v44 }
  0xb9   :  { %454 = vrot.lane.b32.xlu0 %v374_v34, %s4343_s1 }
  0xba   :  { %456 = vrot.lane.b32.xlu1 %v375_v50, %s4343_s1 }
  0xbd   :  { %458 = vrot.lane.b32.xlu0 %v376_v41, %s4343_s1 }
  0xbe   :  { %460 = vrot.lane.b32.xlu1 %v377_v49, %s4343_s1 }
  0xc1   :  { %462 = vrot.lane.b32.xlu0 %v378_v55, %s4343_s1 }
  0xc2   :  { %464 = vrot.lane.b32.xlu1 %v379_v57, %s4343_s1 }
  0xc5   :  { %466 = vrot.lane.b32.xlu0 %v380_v61, %s4343_s1  ;;  %v293_v61 = vrot.slane %v4664_v62, 7 }
  0xc6   :  { %468 = vrot.lane.b32.xlu1 %v381_v3, %s4343_s1  ;;  %v294_v3 = vrot.slane %v4676_v24, 7 }
  0xc9   :  { %470 = vrot.lane.b32.xlu0 %v382_v7, %s4343_s1  ;;  %v296_v7 = vrot.slane %v4690_v13, 7 }
  0xca   :  { %472 = vrot.lane.b32.xlu1 %v383_v12, %s4343_s1  ;;  %v299_v12 = vrot.slane %v4704_v21, 7 }
  0xcd   :  { %474 = vrot.lane.b32.xlu0 %v384_v27, %s4343_s1  ;;  %v300_v27 = vrot.slane %v4713_v23, 7 }
  0xce   :  { %476 = vrot.lane.b32.xlu1 %v385_v40, %s4343_s1  ;;  %v326_v40 = vsel %vm324_vm4, %v4664_v62, %v293_v61  ;;  %v329_v62 = vsel %vm324_vm4, %v4690_v13, %v296_v7  ;;  %v4958_v61 = vsel %vm324_vm4, %v4704_v21, %v299_v12 }
  0xcf   :  { %v4967_v10 = vsel %vm324_vm4, %v4713_v23, %v300_v27  ;;  %v306_v23 = vrot.slane %v4831_v26, 7 }
  0xd1   :  { %478 = vrot.lane.b32.xlu0 %v386_v33, %s4343_s1  ;;  %v301_v33 = vrot.slane %v4728_v35, 7 }
  0xd2   :  { %480 = vrot.lane.b32.xlu1 %v387_v22, %s4343_s1  ;;  %v328_v22 = vsel %vm324_vm4, %v4673_v5, %v295_v63  ;;  %v331_v5 = vsel %vm324_vm4, %v4701_v20, %v298_v14  ;;  %v4976_v20 = vsel %vm324_vm4, %v4750_v45, %v302_v17  ;;  %v307_v17 = vrot.slane %v4840_v44, 7 }
  0xd3   :  { %v4972_v21 = vsel %vm324_vm4, %v4728_v35, %v301_v33  ;;  %v4987_v35 = vsel %vm324_vm4, %v4791_v2, %v303_v60 }
  0xd5   :  { %482 = vrot.lane.b32.xlu0 %v388_v25, %s4343_s1  ;;  %v327_v25 = vsel %vm324_vm4, %v4676_v24, %v294_v3  ;;  %v304_v24 = vrot.slane %v4811_v19, 7 }
  0xd6   :  { %484 = vrot.lane.b32.xlu1 %v389_v28, %s4343_s1 }
  0xf0   :  { %v391_v36 = vpop.permute.xlu0 %390 }
  0xf1   :  { %v503_v47 = vsel %vm502_vm5, %v325_v15, %v391_v36 }
  0xf4   :  { %v393_v30 = vpop.permute.xlu1 %392 }
  0xf5   :  { %v504_v63 = vsel %vm502_vm5, %v326_v40, %v393_v30  ;;  %v305_v30 = vrot.slane %v4824_v54, 7 }
  0xfb   :  { %v395_v31 = vpop.permute.xlu0 %394  ;;  %v397_v34 = vpop.permute.xlu1 %396 }
  0xfc   :  { %v505_v12 = vsel %vm502_vm5, %v327_v25, %v395_v31  ;;  %v506_v33 = vsel %vm502_vm5, %v328_v22, %v397_v34  ;;  %v4999_v31 = vsel %vm324_vm4, %v4811_v19, %v304_v24  ;;  %v5015_v22 = vsel %vm324_vm4, %v4824_v54, %v305_v30 }
 0x103   :  { %v4907_v4 = vpop.permute.xlu0 %398  ;;  %v4909_v50 = vpop.permute.xlu1 %400 }
 0x104   :  { %v507_v19 = vsel %vm502_vm5, %v329_v62, %v4907_v4  ;;  %v5038_v62 = vsel %vm324_vm4, %v4840_v44, %v307_v17 }
 0x10b   :  { %v4911_v39 = vpop.permute.xlu0 %402  ;;  %v4913_v41 = vpop.permute.xlu1 %404 }
 0x10c   :  { %v509_v44 = vsel %vm502_vm5, %v331_v5, %v4911_v39  ;;  %v510_v5 = vsel %vm502_vm5, %v4958_v61, %v4913_v41 }
 0x10f   :  { %v4915_v46 = vpop.permute.xlu0 %406 }
 0x110   :  { %v511_v61 = vsel %vm502_vm5, %v4967_v10, %v4915_v46 }
 0x113   :  { %v4917_v49 = vpop.permute.xlu1 %408 }
 0x114   :  { %v512_v10 = vsel %vm502_vm5, %v4972_v21, %v4917_v49 }
 0x117   :  { %v4919_v51 = vpop.permute.xlu0 %410 }
 0x118   :  { %v513_v21 = vsel %vm502_vm5, %v4976_v20, %v4919_v51 }
 0x11b   :  { %v4921_v55 = vpop.permute.xlu1 %412 }
 0x11c   :  { %v514_v20 = vsel %vm502_vm5, %v4987_v35, %v4921_v55 }
 0x11f   :  { %v4923_v56 = vpop.permute.xlu0 %414 }
 0x120   :  { %v515_v55 = vsel %vm502_vm5, %v4999_v31, %v4923_v56 }
 0x123   :  { %v4925_v57 = vpop.permute.xlu1 %416 }
 0x124   :  { %v516_v31 = vsel %vm502_vm5, %v5015_v22, %v4925_v57 }
 0x127   :  { %v4933_v8 = vpop.permute.xlu0 %418 }
 0x128   :  { %v4942_v16 = vpop.permute.xlu1 %420 }
 0x12b   :  { %v455_v28 = vpop.permute.xlu0 %454 }
 0x12c   :  { %v520_v36 = vsel %vm519_vm6, %v503_v47, %v455_v28  ;;  %v457_v3 = vpop.permute.xlu1 %456 }
 0x12d   :  { %v550_v13 = vsel %vm548_vm7, %v520_v36, 0  ;;  %v521_v7 = vsel %vm519_vm6, %v504_v63, %v457_v3  ;;  %v5019_v36 = vsel %vm324_vm4, %v4831_v26, %v306_v23  ;;  %v508_v26 = vsel %vm502_vm5, %v330_v58, %v4909_v50 }
 0x12e   :  { %v4978_v18 = vand.u32 4294901760, %v550_v13  ;;  %v553_v14 = vsel %vm548_vm7, %v521_v7, 0  ;;  %v517_v22 = vsel %vm502_vm5, %v5019_v36, %v4933_v8  ;;  %v518_v8 = vsel %vm502_vm5, %v5038_v62, %v4942_v16 }
 0x12f   :  { %v459_v27 = vpop.permute.xlu0 %458  ;;  %v4992_v15 = vand.u32 4294901760, %v553_v14 }
 0x130   :  { %v4990_v45 = vsub.f32 %v550_v13, %v4978_v18  ;;  %v522_v40 = vsel %vm519_vm6, %v505_v12, %v459_v27  ;;  %3898 = vmatprep.mubr.f32.mxu1 %v4978_v18  ;;  %v461_v47 = vpop.permute.xlu1 %460 }
 0x131   :  { %v556_v2 = vsel %vm548_vm7, %v522_v40, 0  ;;  %v5004_v25 = vsub.f32 %v553_v14, %v4992_v15  ;;  %v523_v60 = vsel %vm519_vm6, %v506_v33, %v461_v47  ;;  %3899 = vmatmul.mubr.f32.vlgmr.msra.gmra.mxu1 %v4992_v15 }
 0x132   :  { %v5006_v28 = vand.u32 4294901760, %v556_v2  ;;  %v673_v34 = vand.u32 4294901760, %v4990_v45  ;;  %v559_v24 = vsel %vm548_vm7, %v523_v60, 0  ;;  %3957 = vmatpush3.msra.mxu1 %v4722_v32 }
 0x133   :  { %v463_v63 = vpop.permute.xlu0 %462  ;;  %v5026_v3 = vand.u32 4294901760, %v559_v24  ;;  %3958 = vmatprep.subr.mxu1 %v4730_v37  ;;  %v683_v23 = vand.u32 4294901760, %v5004_v25 }
 0x134   :  { %v5024_v13 = vsub.f32 %v556_v2, %v5006_v28  ;;  %v524_v4 = vsel %vm519_vm6, %v507_v19, %v463_v63  ;;  %3901 = vmatprep.mubr.f32.mxu1 %v5006_v28  ;;  %v674_v54 = vsub.f32 %v4990_v45, %v673_v34  ;;  %v465_v30 = vpop.permute.xlu1 %464  ;;  %3959 = vmatpush3.msra.mxu1 %v4730_v37 }
 0x135   :  { %v562_v7 = vsel %vm548_vm7, %v524_v4, 0  ;;  %v5044_v12 = vsub.f32 %v559_v24, %v5026_v3  ;;  %v525_v27 = vsel %vm519_vm6, %v508_v26, %v465_v30  ;;  %3902 = vmatmul.mubr.f32.gmra.mxu1 %v5026_v3  ;;  %3960 = vmatprep.subr.mxu1 %v4746_v43  ;;  %v684_v33 = vsub.f32 %v5004_v25, %v683_v23 }
 0x136   :  { %v5046_v14 = vand.u32 4294901760, %v562_v7  ;;  %v675_v50 = vand.u32 4294901760, %v674_v54  ;;  %v565_v58 = vsel %vm548_vm7, %v525_v27, 0  ;;  %v693_v17 = vand.u32 4294901760, %v5024_v13  ;;  %3961 = vmatpush3.msra.mxu1 %v4746_v43 }
 0x137   :  { %v467_v40 = vpop.permute.xlu0 %466  ;;  %v5062_v47 = vand.u32 4294901760, %v565_v58  ;;  %v703_v39 = vand.u32 4294901760, %v5044_v12  ;;  %v685_v63 = vand.u32 4294901760, %v684_v33  ;;  %3962 = vmatprep.subr.mxu1 %v4770_v53 }
 0x138   :  { %v5060_v2 = vsub.f32 %v562_v7, %v5046_v14  ;;  %v526_v60 = vsel %vm519_vm6, %v509_v44, %v467_v40  ;;  %3864 = vmatprep.mubr.f32.mxu0 %v675_v50  ;;  %3904 = vmatprep.mubr.f32.mxu1 %v5046_v14  ;;  %v469_v24 = vpop.permute.xlu1 %468  ;;  %v694_v4 = vsub.f32 %v5024_v13, %v693_v17 }
 0x139   :  { %v568_v19 = vsel %vm548_vm7, %v526_v60, 0  ;;  %v5076_v54 = vsub.f32 %v565_v58, %v5062_v47  ;;  %v527_v7 = vsel %vm519_vm6, %v510_v5, %v469_v24  ;;  %3905 = vmatmul.mubr.f32.gmra.mxu1 %v5062_v47  ;;  %v704_v41 = vsub.f32 %v5044_v12, %v703_v39  ;;  %3865 = vmatmul.mubr.f32.vlgmr.msra.gmra.mxu0 %v685_v63 }
 0x13a   :  { %v5078_v26 = vand.u32 4294901760, %v568_v19  ;;  %v571_v30 = vsel %vm548_vm7, %v527_v7, 0  ;;  %v695_v50 = vand.u32 4294901760, %v694_v4  ;;  %v713_v44 = vand.u32 4294901760, %v5060_v2  ;;  %3963 = vmatpush3.msra.mxu1 %v4770_v53  ;;  %3923 = vmatpush3.msra.mxu0 %v4735_v38 }
 0x13b   :  { %v471_v27 = vpop.permute.xlu0 %470  ;;  %v5094_v40 = vand.u32 4294901760, %v571_v30  ;;  %v705_v46 = vand.u32 4294901760, %v704_v41  ;;  %3924 = vmatprep.subr.mxu0 %v4744_v42  ;;  %v723_v38 = vand.u32 4294901760, %v5076_v54  ;;  %3964 = vmatprep.subr.mxu1 %v4778_v59 }
 0x13c   :  { %v5092_v58 = vsub.f32 %v568_v19, %v5078_v26  ;;  %v528_v33 = vsel %vm519_vm6, %v511_v61, %v471_v27  ;;  %3907 = vmatprep.mubr.f32.mxu1 %v5078_v26  ;;  %v473_v5 = vpop.permute.xlu1 %472  ;;  %3867 = vmatprep.mubr.f32.mxu0 %v695_v50  ;;  %v714_v19 = vsub.f32 %v5060_v2, %v713_v44 }
 0x13d   :  { %v574_v60 = vsel %vm548_vm7, %v528_v33, 0  ;;  %v5109_v24 = vsub.f32 %v571_v30, %v5094_v40  ;;  %v529_v4 = vsel %vm519_vm6, %v512_v10, %v473_v5  ;;  %3908 = vmatmul.mubr.f32.gmra.mxu1 %v5094_v40  ;;  %3925 = vmatpush3.msra.mxu0 %v4744_v42  ;;  %v724_v30 = vsub.f32 %v5076_v54, %v723_v38 }
 0x13e   :  { %v5111_v63 = vand.u32 4294901760, %v574_v60  ;;  %v733_v49 = vand.u32 4294901760, %v5092_v58  ;;  %v577_v7 = vsel %vm548_vm7, %v529_v4, 0  ;;  %3868 = vmatmul.mubr.f32.gmra.mxu0 %v705_v46  ;;  %v715_v61 = vand.u32 4294901760, %v714_v19  ;;  %3926 = vmatprep.subr.mxu0 %v4768_v52 }
 0x13f   :  { %v475_v41 = vpop.permute.xlu0 %474  ;;  %v5128_v42 = vand.u32 4294901760, %v577_v7  ;;  %3927 = vmatpush3.msra.mxu0 %v4768_v52  ;;  %v725_v10 = vand.u32 4294901760, %v724_v30  ;;  %3965 = vmatpush3.msra.mxu1 %v4778_v59 }
 0x140   :  { %v5126_v27 = vsub.f32 %v574_v60, %v5111_v63  ;;  %v530_v50 = vsel %vm519_vm6, %v513_v21, %v475_v41  ;;  %3910 = vmatprep.mubr.f32.mxu1 %v5111_v63  ;;  %v734_v51 = vsub.f32 %v5092_v58, %v733_v49  ;;  %v477_v46 = vpop.permute.xlu1 %476  ;;  %3870 = vmatprep.mubr.f32.mxu0 %v715_v61  ;;  %v743_v60 = vand.u32 4294901760, %v5109_v24 }
 0x141   :  { %v580_v33 = vsel %vm548_vm7, %v530_v50, 0  ;;  %3928 = vmatprep.subr.mxu0 %v4787_v1  ;;  %v5143_v5 = vsub.f32 %v577_v7, %v5128_v42  ;;  %v531_v52 = vsel %vm519_vm6, %v514_v20, %v477_v46  ;;  %3911 = vmatmul.mubr.f32.gmra.mxu1 %v5128_v42 }
 0x142   :  { %v5145_v19 = vand.u32 4294901760, %v580_v33  ;;  %v735_v4 = vand.u32 4294901760, %v734_v51  ;;  %3929 = vmatpush3.msra.mxu0 %v4787_v1  ;;  %v583_v35 = vsel %vm548_vm7, %v531_v52, 0  ;;  %v744_v7 = vsub.f32 %v5109_v24, %v743_v60  ;;  %4024 = vmatprep.subr.mxu1 %v4722_v32 }
 0x143   :  { %3871 = vmatmul.mubr.f32.gmra.mxu0 %v725_v10  ;;  %v479_v21 = vpop.permute.xlu0 %478  ;;  %v753_v41 = vand.u32 4294901760, %v5126_v27  ;;  %v5162_v1 = vand.u32 4294901760, %v583_v35  ;;  %v763_v56 = vand.u32 4294901760, %v5143_v5  ;;  %3930 = vmatprep.subr.mxu0 %v4794_v6 }
 0x144   :  { %v5160_v61 = vsub.f32 %v580_v33, %v5145_v19  ;;  %v532_v30 = vsel %vm519_vm6, %v515_v55, %v479_v21  ;;  %3873 = vmatprep.mubr.f32.mxu0 %v735_v4  ;;  %3913 = vmatprep.mubr.f32.mxu1 %v5145_v19  ;;  %v481_v51 = vpop.permute.xlu1 %480  ;;  %v745_v20 = vand.u32 4294901760, %v744_v7 }
 0x145   :  { %v586_v50 = vsel %vm548_vm7, %v532_v30, 0  ;;  %v754_v33 = vsub.f32 %v5126_v27, %v753_v41  ;;  %v5177_v46 = vsub.f32 %v583_v35, %v5162_v1  ;;  %v533_v52 = vsel %vm519_vm6, %v516_v31, %v481_v51  ;;  %3914 = vmatmul.mubr.f32.gmra.mxu1 %v5162_v1  ;;  %3931 = vmatpush3.msra.mxu0 %v4794_v6 }
 0x146   :  { %v5179_v10 = vand.u32 4294901760, %v586_v50  ;;  %v764_v57 = vsub.f32 %v5143_v5, %v763_v56  ;;  %v589_v4 = vsel %vm548_vm7, %v533_v52, 0  ;;  %v773_v21 = vand.u32 4294901760, %v5160_v61  ;;  %3990 = vmatprep.subr.mxu0 %v4753_v48 }
 0x147   :  { %3874 = vmatmul.mubr.f32.gmra.mxu0 %v745_v20  ;;  %v483_v55 = vpop.permute.xlu0 %482  ;;  %v755_v35 = vand.u32 4294901760, %v754_v33  ;;  %v5196_v30 = vand.u32 4294901760, %v589_v4  ;;  %v6461_v20 = vand.u32 4294901760, %v5177_v46 }
 0x148   :  { %v5194_v7 = vsub.f32 %v586_v50, %v5179_v10  ;;  %v534_v6 = vsel %vm519_vm6, %v517_v22, %v483_v55  ;;  %3916 = vmatprep.mubr.f32.mxu1 %v5179_v10  ;;  %v765_v31 = vand.u32 4294901760, %v764_v57  ;;  %v485_v51 = vpop.permute.xlu1 %484  ;;  %v774_v50 = vsub.f32 %v5160_v61, %v773_v21 }
 0x149   :  { %v592_v36 = vsel %vm548_vm7, %v534_v6, 0  ;;  %3876 = vmatprep.mubr.f32.mxu0 %v755_v35  ;;  %v5210_v33 = vsub.f32 %v589_v4, %v5196_v30  ;;  %v535_v57 = vsel %vm519_vm6, %v518_v8, %v485_v51  ;;  %3917 = vmatmul.mubr.f32.gmra.mxu1 %v5196_v30  ;;  %v784_v55 = vsub.f32 %v5177_v46, %v6461_v20 }
 0x14a   :  { %v5212_v52 = vand.u32 4294901760, %v592_v36  ;;  %v6460_v16 = vand.u32 4294901760, %v5194_v7  ;;  %v595_v62 = vsel %vm548_vm7, %v535_v57, 0  ;;  %v775_v22 = vand.u32 4294901760, %v774_v50 }
 0x14b   :  { %3877 = vmatmul.mubr.f32.gmra.mxu0 %v765_v31  ;;  %v5224_v4 = vand.u32 4294901760, %v595_v62  ;;  %v803_v8 = vand.u32 4294901760, %v5210_v33  ;;  %v785_v31 = vand.u32 4294901760, %v784_v55 }
 0x14c   :  { %v5222_v35 = vsub.f32 %v592_v36, %v5212_v52  ;;  %3919 = vmatprep.mubr.f32.mxu1 %v5212_v52  ;;  %v794_v6 = vsub.f32 %v5194_v7, %v6460_v16  ;;  %3879 = vmatprep.mubr.f32.mxu0 %v775_v22 }
 0x14d   :  { %v5232_v51 = vsub.f32 %v595_v62, %v5224_v4  ;;  %3920 = vmatmul.mubr.f32.gmra.mxu1 %v5224_v4  ;;  %v804_v36 = vsub.f32 %v5210_v33, %v803_v8 }
 0x14e   :  { %v795_v50 = vand.u32 4294901760, %v794_v6  ;;  %v813_v57 = vand.u32 4294901760, %v5222_v35  ;;  %3966 = vmatprep.mubr.f32.mxu1 %v673_v34 }
 0x14f   :  { %3880 = vmatmul.mubr.f32.gmra.mxu0 %v785_v31  ;;  %v805_v16 = vand.u32 4294901760, %v804_v36  ;;  %v823_v22 = vand.u32 4294901760, %v5232_v51 }
 0x150   :  { %3882 = vmatprep.mubr.f32.mxu0 %v795_v50  ;;  %v814_v20 = vsub.f32 %v5222_v35, %v813_v57 }
 0x151   :  { %3967 = vmatmul.mubr.f32.vlgmr.msra.gmra.mxu1 %v683_v23  ;;  %v824_v55 = vsub.f32 %v5232_v51, %v823_v22 }
 0x152   :  { %v815_v62 = vand.u32 4294901760, %v814_v20  ;;  %3969 = vmatprep.mubr.f32.mxu1 %v693_v17  ;;  %4025 = vmatpush3.msra.mxu1 %v4722_v32  ;;  %v6473_v32 = vand.u32 4294901760, %v5177_v46 }
 0x153   :  { %3883 = vmatmul.mubr.f32.gmra.mxu0 %v805_v16  ;;  %v825_v6 = vand.u32 4294901760, %v824_v55  ;;  %4026 = vmatprep.subr.mxu1 %v4730_v37 }
 0x154   :  { %3885 = vmatprep.mubr.f32.mxu0 %v815_v62  ;;  %4027 = vmatpush3.msra.mxu1 %v4730_v37  ;;  %v6474_v37 = vand.u32 4294901760, %v5194_v7 }
 0x155   :  { %3970 = vmatmul.mubr.f32.gmra.mxu1 %v703_v39  ;;  %4028 = vmatprep.subr.mxu1 %v4746_v43 }
 0x156   :  { %3972 = vmatprep.mubr.f32.mxu1 %v713_v44  ;;  %4029 = vmatpush3.msra.mxu1 %v4746_v43 }
 0x157   :  { %3886 = vmatmul.mubr.f32.gmra.mxu0 %v825_v6  ;;  %4030 = vmatprep.subr.mxu1 %v4770_v53 }
 0x158   :  { %3932 = vmatprep.mubr.f32.mxu0 %v4990_v45  ;;  %4031 = vmatpush3.msra.mxu1 %v4770_v53 }
 0x159   :  { %3973 = vmatmul.mubr.f32.gmra.mxu1 %v723_v38  ;;  %4032 = vmatprep.subr.mxu1 %v4778_v59 }
 0x15a   :  { %3975 = vmatprep.mubr.f32.mxu1 %v733_v49  ;;  %4033 = vmatpush3.msra.mxu1 %v4778_v59 }
 0x15b   :  { %3933 = vmatmul.mubr.f32.vlgmr.msra.gmra.mxu0 %v5004_v25 }
 0x15c   :  { %3991 = vmatpush3.msra.mxu0 %v4753_v48  ;;  %3935 = vmatprep.mubr.f32.mxu0 %v5024_v13 }
 0x15d   :  { %3992 = vmatprep.subr.mxu0 %v4762_v11  ;;  %3976 = vmatmul.mubr.f32.gmra.mxu1 %v743_v60 }
 0x15e   :  { %3993 = vmatpush3.msra.mxu0 %v4762_v11  ;;  %3978 = vmatprep.mubr.f32.mxu1 %v753_v41 }
 0x15f   :  { %3936 = vmatmul.mubr.f32.gmra.mxu0 %v5044_v12  ;;  %3994 = vmatprep.subr.mxu0 %v4784_v0  ;;  %v5359_v12 = vld [vmem:[%s6456_s2] ss:$0 sm:$0xff]  ;;  %s4344_s2 = smov 16  }
 0x160   :  { %3938 = vmatprep.mubr.f32.mxu0 %v5060_v2  ;;  %3995 = vmatpush3.msra.mxu0 %v4784_v0 }
 0x161   :  { %3979 = vmatmul.mubr.f32.gmra.mxu1 %v763_v56  ;;  %3996 = vmatprep.subr.mxu0 %v4804_v29 }
 0x162   :  { %3981 = vmatprep.mubr.f32.mxu1 %v773_v21  ;;  %3997 = vmatpush3.msra.mxu0 %v4804_v29 }
 0x163   :  { %3939 = vmatmul.mubr.f32.gmra.mxu0 %v5076_v54  ;;  %3998 = vmatprep.subr.mxu0 %v4807_v9 }
 0x164   :  { %3941 = vmatprep.mubr.f32.mxu0 %v5092_v58  ;;  %3999 = vmatpush3.msra.mxu0 %v4807_v9 }
 0x165   :  { %3982 = vmatmul.mubr.f32.gmra.mxu1 %v6473_v32 }
 0x166   :  { %3984 = vmatprep.mubr.f32.mxu1 %v6474_v37 }
 0x167   :  { %3942 = vmatmul.mubr.f32.gmra.mxu0 %v5109_v24 }
 0x168   :  { %3944 = vmatprep.mubr.f32.mxu0 %v5126_v27 }
 0x169   :  { %3985 = vmatmul.mubr.f32.gmra.mxu1 %v803_v8 }
 0x16a   :  { %3987 = vmatprep.mubr.f32.mxu1 %v813_v57 }
 0x16b   :  { %3945 = vmatmul.mubr.f32.gmra.mxu0 %v5143_v5 }
 0x16c   :  { %3947 = vmatprep.mubr.f32.mxu0 %v5160_v61 }
 0x16d   :  { %3988 = vmatmul.mubr.f32.gmra.mxu1 %v823_v22 }
 0x16e   :  { %4034 = vmatprep.mubr.f32.mxu1 %v4978_v18 }
 0x16f   :  { %3948 = vmatmul.mubr.f32.gmra.mxu0 %v5177_v46 }
 0x170   :  { %3950 = vmatprep.mubr.f32.mxu0 %v5194_v7 }
 0x171   :  { %4035 = vmatmul.mubr.f32.vlgmr.msra.gmra.mxu1 %v4992_v15 }
 0x172   :  { %4037 = vmatprep.mubr.f32.mxu1 %v5006_v28 }
 0x173   :  { %3951 = vmatmul.mubr.f32.gmra.mxu0 %v5210_v33 }
 0x174   :  { %3953 = vmatprep.mubr.f32.mxu0 %v5222_v35 }
 0x175   :  { %4038 = vmatmul.mubr.f32.gmra.mxu1 %v5026_v3 }
 0x176   :  { %4040 = vmatprep.mubr.f32.mxu1 %v5046_v14 }
 0x177   :  { %3954 = vmatmul.mubr.f32.gmra.mxu0 %v5232_v51 }
 0x178   :  { %4000 = vmatprep.mubr.f32.mxu0 %v4978_v18 }
 0x179   :  { %4041 = vmatmul.mubr.f32.gmra.mxu1 %v5062_v47 }
 0x17a   :  { %4043 = vmatprep.mubr.f32.mxu1 %v5078_v26 }
 0x17b   :  { %4001 = vmatmul.mubr.f32.vlgmr.msra.gmra.mxu0 %v4992_v15 }
 0x17c   :  { %4003 = vmatprep.mubr.f32.mxu0 %v5006_v28 }
 0x17d   :  { %4044 = vmatmul.mubr.f32.gmra.mxu1 %v5094_v40 }
 0x17e   :  { %4046 = vmatprep.mubr.f32.mxu1 %v5111_v63 }
 0x17f   :  { %4004 = vmatmul.mubr.f32.gmra.mxu0 %v5026_v3 }
 0x180   :  { %4006 = vmatprep.mubr.f32.mxu0 %v5046_v14 }
 0x181   :  { %4047 = vmatmul.mubr.f32.gmra.mxu1 %v5128_v42 }
 0x182   :  { %4049 = vmatprep.mubr.f32.mxu1 %v5145_v19 }
 0x183   :  { %4007 = vmatmul.mubr.f32.gmra.mxu0 %v5062_v47 }
 0x184   :  { %4009 = vmatprep.mubr.f32.mxu0 %v5078_v26 }
 0x185   :  { %4050 = vmatmul.mubr.f32.gmra.mxu1 %v5162_v1 }
 0x186   :  { %4052 = vmatprep.mubr.f32.mxu1 %v5179_v10 }
 0x187   :  { %4010 = vmatmul.mubr.f32.gmra.mxu0 %v5094_v40 }
 0x188   :  { %4012 = vmatprep.mubr.f32.mxu0 %v5111_v63 }
 0x189   :  { %4053 = vmatmul.mubr.f32.gmra.mxu1 %v5196_v30 }
 0x18a   :  { %4055 = vmatprep.mubr.f32.mxu1 %v5212_v52 }
 0x18b   :  { %4013 = vmatmul.mubr.f32.gmra.mxu0 %v5128_v42 }
 0x18c   :  { %4015 = vmatprep.mubr.f32.mxu0 %v5145_v19 }
 0x18d   :  { %4056 = vmatmul.mubr.f32.gmra.mxu1 %v5224_v4 }
 0x18f   :  { %4016 = vmatmul.mubr.f32.gmra.mxu0 %v5162_v1 }
 0x190   :  { %4018 = vmatprep.mubr.f32.mxu0 %v5179_v10 }
 0x193   :  { %4019 = vmatmul.mubr.f32.gmra.mxu0 %v5196_v30 }
 0x194   :  { %4021 = vmatprep.mubr.f32.mxu0 %v5212_v52 }
 0x197   :  { %4022 = vmatmul.mubr.f32.gmra.mxu0 %v5224_v4 }
 0x1f1   :  { %v5332_v43 = vpop.f32.mrf.mxu1 }
 0x1f3   :  { %v5334_v48 = vpop.f32.mrf.mxu1 }
 0x1f5   :  { %v5336_v11 = vpop.f32.mrf.mxu1 }
 0x1f7   :  { %v5338_v53 = vpop.f32.mrf.mxu1 }
 0x1f9   :  { %v5340_v59 = vpop.f32.mrf.mxu1  ;;  %v5342_v0 = vpop.f32.mrf.mxu0 }
 0x1fb   :  { %v5344_v29 = vpop.f32.mrf.mxu1  ;;  %v5346_v9 = vpop.f32.mrf.mxu0 }
 0x1fd   :  { %v3909_v18 = vpop.f32.mrf.mxu1 }
 0x1fe   :  { %v5348_v45 = vpop.f32.mrf.mxu0 }
 0x1ff   :  { %v959_v15 = vpop.f32.mrf.mxu1 }
 0x200   :  { %v5350_v25 = vpop.f32.mrf.mxu0 }
 0x201   :  { %v3912_v28 = vpop.f32.mrf.mxu1 }
 0x203   :  { %v5352_v34 = vpop.f32.mrf.mxu0  ;;  %v971_v13 = vpop.f32.mrf.mxu1 }
 0x205   :  { %v5354_v3 = vpop.f32.mrf.mxu0  ;;  %v3915_v23 = vpop.f32.mrf.mxu1 }
 0x207   :  { %v3875_v14 = vpop.f32.mrf.mxu0  ;;  %v983_v2 = vpop.f32.mrf.mxu1 }
 0x208   :  { %v748_v17 = vadd.f32 %v3875_v14, %v5359_v12 }
 0x209   :  { %v737_v47 = vpop.f32.mrf.mxu0  ;;  %v3918_v54 = vpop.f32.mrf.mxu1 }
 0x20a   :  { %v738_v39 = vadd.f32 %v5359_v12, %v737_v47  ;;  %v5363_v26 = vadd.f32 %v3909_v18, %v748_v17 }
 0x20b   :  { %v3878_v44 = vpop.f32.mrf.mxu0  ;;  %v995_v40 = vpop.f32.mrf.mxu1 }
 0x20c   :  { %v768_v58 = vadd.f32 %v3878_v44, %v5359_v12  ;;  %v5366_v38 = vadd.f32 %v959_v15, %v738_v39 }
 0x20d   :  { %v757_v24 = vpop.f32.mrf.mxu0  ;;  %v3921_v49 = vpop.f32.mrf.mxu1 }
 0x20e   :  { %v758_v63 = vadd.f32 %v5359_v12, %v757_v24  ;;  %v5369_v27 = vadd.f32 %v3912_v28, %v768_v58 }
 0x20f   :  { %v3881_v42 = vpop.f32.mrf.mxu0  ;;  %v1007_v5 = vpop.f32.mrf.mxu1 }
 0x210   :  { %v788_v60 = vadd.f32 %v3881_v42, %v5359_v12  ;;  %v5372_v19 = vadd.f32 %v971_v13, %v758_v63  ;;  %v688_v63 = vadd.f32 %v5342_v0, %v5359_v12 }
 0x211   :  { %v777_v41 = vpop.f32.mrf.mxu0  ;;  %v3968_v1 = vpop.f32.mrf.mxu1 }
 0x212   :  { %v778_v61 = vadd.f32 %v5359_v12, %v777_v41  ;;  %v5375_v56 = vadd.f32 %v3915_v23, %v788_v60  ;;  %v678_v60 = vadd.f32 %v5359_v12, %v5346_v9  ;;  %v728_v9 = vadd.f32 %v5352_v34, %v5359_v12 }
 0x213   :  { %v3884_v46 = vpop.f32.mrf.mxu0  ;;  %v5378_v21 = vpop.f32.mrf.mxu1 }
 0x214   :  { %v808_v10 = vadd.f32 %v3884_v46, %v5359_v12  ;;  %v5380_v7 = vadd.f32 %v983_v2, %v778_v61  ;;  %v708_v61 = vadd.f32 %v5348_v45, %v5359_v12  ;;  %v930_v46 = vadd.f32 %v5332_v43, %v688_v63 }
 0x215   :  { %v797_v30 = vpop.f32.mrf.mxu0  ;;  %v5383_v33 = vpop.f32.mrf.mxu1  ;;  %v718_v43 = vadd.f32 %v5359_v12, %v5354_v3 }
 0x216   :  { %v798_v20 = vadd.f32 %v5359_v12, %v797_v30  ;;  %v5385_v52 = vadd.f32 %v3918_v54, %v808_v10  ;;  %v698_v10 = vadd.f32 %v5359_v12, %v5350_v25 }
 0x217   :  { %v3887_v16 = vpop.f32.mrf.mxu0  ;;  %v5388_v4 = vpop.f32.mrf.mxu1 }
 0x218   :  { %v828_v35 = vadd.f32 %v3887_v16, %v5359_v12  ;;  %v5390_v8 = vadd.f32 %v995_v40, %v798_v20  ;;  %v924_v16 = vadd.f32 %v5334_v48, %v678_v60  ;;  %v936_v45 = vadd.f32 %v5338_v53, %v698_v10 }
 0x219   :  { %v817_v31 = vpop.f32.mrf.mxu0  ;;  %v5393_v50 = vpop.f32.mrf.mxu1  ;;  %v954_v60 = vadd.f32 %v5340_v59, %v728_v9 }
 0x21a   :  { %v818_v51 = vadd.f32 %v5359_v12, %v817_v31  ;;  %v5395_v36 = vadd.f32 %v3921_v49, %v828_v35 }
 0x21b   :  { %v3934_v57 = vpop.f32.mrf.mxu0  ;;  %v5397_v22 = vpop.f32.mrf.mxu1 }
 0x21c   :  { %v5399_v62 = vadd.f32 %v1007_v5, %v818_v51  ;;  %v1103_v20 = vadd.f32 %v3934_v57, %v930_v46  ;;  %v942_v51 = vadd.f32 %v5336_v11, %v708_v61 }
 0x21d   :  { %v1095_v55 = vpop.f32.mrf.mxu0  ;;  %v5401_v6 = vpop.f32.mrf.mxu1 }
 0x21e   :  { %v1096_v31 = vadd.f32 %v1095_v55, %v924_v16  ;;  %v1287_v57 = vadd.f32 %v3968_v1, %v1103_v20  ;;  %v948_v55 = vadd.f32 %v5344_v29, %v718_v43 }
 0x21f   :  { %v3937_v32 = vpop.f32.mrf.mxu0  ;;  %v5403_v37 = vpop.f32.mrf.mxu1 }
 0x220   :  { %v1279_v34 = vadd.f32 %v5378_v21, %v1096_v31 }
 0x221   :  { %v1109_v18 = vpop.f32.mrf.mxu0  ;;  %v5405_v15 = vpop.f32.mrf.mxu1 }
 0x222   :  { %v1110_v46 = vadd.f32 %v1109_v18, %v936_v45 }
 0x223   :  { %v3940_v28 = vpop.f32.mrf.mxu0  ;;  %v5407_v13 = vpop.f32.mrf.mxu1 }
 0x224   :  { %v1131_v16 = vadd.f32 %v3940_v28, %v954_v60  ;;  %v1295_v1 = vadd.f32 %v5388_v4, %v1110_v46 }
 0x225   :  { %v1123_v23 = vpop.f32.mrf.mxu0  ;;  %v5409_v14 = vpop.f32.mrf.mxu1 }
 0x226   :  { %v1124_v10 = vadd.f32 %v1123_v23, %v948_v55  ;;  %v1319_v28 = vadd.f32 %v5393_v50, %v1131_v16 }
 0x227   :  { %v3943_v17 = vpop.f32.mrf.mxu0  ;;  %v5411_v2 = vpop.f32.mrf.mxu1 }
 0x228   :  { %v1311_v4 = vadd.f32 %v5397_v22, %v1124_v10 }
 0x229   :  { %v5413_v47 = vpop.f32.mrf.mxu0  ;;  %v5415_v39 = vpop.f32.mrf.mxu1 }
 0x22b   :  { %v5417_v54 = vpop.f32.mrf.mxu0  ;;  %v5419_v44 = vpop.f32.mrf.mxu1 }
 0x22d   :  { %v5421_v58 = vpop.f32.mrf.mxu0  ;;  %v5423_v40 = vpop.f32.mrf.mxu1 }
 0x22e   :  { %6475 = vst [vmem:[#allocation5_spill] sm:$0xff] %v5423_v40 }
 0x22f   :  { %v5425_v24 = vpop.f32.mrf.mxu0  ;;  %v5429_v49 = vpop.f32.mrf.mxu1 }
 0x230   :  { %6476 = vst [vmem:[#allocation6_spill] sm:$0xff] %v5429_v49  ;;  %v1117_v49 = vadd.f32 %v3937_v32, %v942_v51 }
 0x231   :  { %v5431_v42 = vpop.f32.mrf.mxu0  ;;  %v4036_v5 = vpop.f32.mrf.mxu1 }
 0x232   :  { %v1303_v53 = vadd.f32 %v5383_v33, %v1117_v49 }
 0x233   :  { %v5435_v41 = vpop.f32.mrf.mxu0  ;;  %v1650_v0 = vpop.f32.mrf.mxu1 }
 0x235   :  { %v5442_v30 = vpop.f32.mrf.mxu0  ;;  %v4039_v25 = vpop.f32.mrf.mxu1 }
 0x237   :  { %v5445_v35 = vpop.f32.mrf.mxu0  ;;  %v1662_v11 = vpop.f32.mrf.mxu1 }
 0x239   :  { %v5453_v63 = vpop.f32.mrf.mxu0  ;;  %v4042_v20 = vpop.f32.mrf.mxu1 }
 0x23a   :  { %6477 = vst [vmem:[#allocation7_spill] sm:$0xff] %v5453_v63 }
 0x23b   :  { %v4002_v48 = vpop.f32.mrf.mxu0  ;;  %v1674_v51 = vpop.f32.mrf.mxu1 }
 0x23c   :  { %v1491_v40 = vadd.f32 %v4002_v48, %v1287_v57 }
 0x23d   :  { %v1484_v61 = vpop.f32.mrf.mxu0  ;;  %v4045_v46 = vpop.f32.mrf.mxu1 }
 0x23e   :  { %v1657_v3 = vadd.f32 %v4036_v5, %v1491_v40  ;;  %v1485_v12 = vadd.f32 %v1484_v61, %v1279_v34  ;;  %v1145_v40 = vadd.f32 %v3943_v17, %v5363_v26 }
 0x23f   :  { %v4005_v63 = vpop.f32.mrf.mxu0 }
 0x240   :  { %v1651_v32 = vadd.f32 %v1650_v0, %v1485_v12  ;;  %v1503_v18 = vadd.f32 %v4005_v63, %v1303_v53  ;;  %vm1745_vm8 = vcmp.ge.f32.partialorder %v1657_v3, 0.0  ;;  %v1761_v59 = vmul.f32 0.01, %v1657_v3 }
 0x241   :  { %v1496_v9 = vpop.f32.mrf.mxu0  ;;  %v1138_v63 = vadd.f32 %v5413_v47, %v5366_v38  ;;  %v1335_v57 = vadd.f32 %v5401_v6, %v1145_v40  ;;  %v1159_v38 = vadd.f32 %v5417_v54, %v5369_v27  ;;  %v1686_v47 = vpop.f32.mrf.mxu1 }
 0x242   :  { %v1669_v21 = vadd.f32 %v4039_v25, %v1503_v18  ;;  %v1497_v31 = vadd.f32 %v1496_v9, %v1295_v1  ;;  %v5460_v29 = vsel %vm1745_vm8, %v1657_v3, %v1761_v59  ;;  %vm1744_vm9 = vcmp.ge.f32.partialorder %v1651_v32, 0.0 }
 0x243   :  { %1856 = vrot.lane.b32.xlu0 %v5460_v29, %s4344_s2  ;;  %1810 = vrot.lane.b32.xlu1 %v5460_v29, %s4340_s27  ;;  %v4008_v33 = vpop.f32.mrf.mxu0  ;;  %v1760_v23 = vmul.f32 0.01, %v1651_v32  ;;  %v1327_v6 = vadd.f32 %v5403_v37, %v1138_v63  ;;  %v1152_v1 = vadd.f32 %v5421_v58, %v5372_v19  ;;  %v1351_v27 = vadd.f32 %v5405_v15, %v1159_v38  ;;  %v4048_v37 = vpop.f32.mrf.mxu1 }
 0x244   :  { %v1663_v49 = vadd.f32 %v1662_v11, %v1497_v31  ;;  %v1515_v5 = vadd.f32 %v4008_v33, %v1319_v28  ;;  %vm1747_vm10 = vcmp.ge.f32.partialorder %v1669_v21, 0.0  ;;  %v1763_v0 = vmul.f32 0.01, %v1669_v21 }
 0x245   :  { %v1508_v50 = vpop.f32.mrf.mxu0  ;;  %v5471_v45 = vsel %vm1744_vm9, %v1651_v32, %v1760_v23  ;;  %v1173_v9 = vadd.f32 %v5425_v24, %v5375_v56  ;;  %v1343_v19 = vadd.f32 %v5407_v13, %v1152_v1  ;;  %v1698_v15 = vpop.f32.mrf.mxu1  ;;  %v1166_v33 = vadd.f32 %v5431_v42, %v5380_v7 }
 0x246   :  { %v1681_v43 = vadd.f32 %v4042_v20, %v1515_v5  ;;  %v1509_v26 = vadd.f32 %v1508_v50, %v1311_v4  ;;  %v5469_v17 = vsel %vm1747_vm10, %v1669_v21, %v1763_v0  ;;  %vm1746_vm11 = vcmp.ge.f32.partialorder %v1663_v49, 0.0 }
 0x247   :  { %1814 = vrot.lane.b32.xlu1 %v5469_v17, %s4340_s27  ;;  %v4011_v25 = vpop.f32.mrf.mxu0  ;;  %1808 = vrot.lane.b32.xlu0 %v5471_v45, %s4340_s27  ;;  %v1762_v22 = vmul.f32 0.01, %v1663_v49  ;;  %v1367_v4 = vadd.f32 %v5409_v14, %v1173_v9  ;;  %v4051_v56 = vpop.f32.mrf.mxu1  ;;  %v1187_v0 = vadd.f32 %v5435_v41, %v5385_v52  ;;  %v1359_v7 = vadd.f32 %v5411_v2, %v1166_v33 }
 0x248   :  { %v1675_v60 = vadd.f32 %v1674_v51, %v1509_v26  ;;  %v1527_v34 = vadd.f32 %v4011_v25, %v1335_v57  ;;  %v1765_v11 = vmul.f32 0.01, %v1681_v43  ;;  %vm1749_vm12 = vcmp.ge.f32.partialorder %v1681_v43, 0.0 }
 0x249   :  { %v1520_v48 = vpop.f32.mrf.mxu0  ;;  %v5480_v55 = vsel %vm1746_vm11, %v1663_v49, %v1762_v22  ;;  %v1710_v42 = vpop.f32.mrf.mxu1  ;;  %v1180_v26 = vadd.f32 %v5442_v30, %v5390_v8  ;;  %v1383_v52 = vadd.f32 %v5415_v39, %v1187_v0  ;;  %v1201_v8 = vadd.f32 %v5445_v35, %v5395_v36  ;;  %v6478_v39 = vld [vmem:[#allocation7_spill] sm:$0xff]  ;;  %v6480_v36 = vld [vmem:[#allocation6_spill] sm:$0xff] }
 0x24a   :  { %v1693_v16 = vadd.f32 %v4045_v46, %v1527_v34  ;;  %v1521_v3 = vadd.f32 %v1520_v48, %v1327_v6  ;;  %v5489_v12 = vsel %vm1749_vm12, %v1681_v43, %v1765_v11  ;;  %v1764_v53 = vmul.f32 0.01, %v1675_v60  ;;  %v6479_v6 = vld [vmem:[#allocation5_spill] sm:$0xff] }
 0x24b   :  { %v4014_v61 = vpop.f32.mrf.mxu0  ;;  %1858 = vrot.lane.b32.xlu1 %v5480_v55, %s4344_s2  ;;  %1860 = vrot.lane.b32.xlu0 %v5469_v17, %s4344_s2  ;;  %vm1748_vm13 = vcmp.ge.f32.partialorder %v1675_v60, 0.0  ;;  %v4054_v2 = vpop.f32.mrf.mxu1  ;;  %v1375_v46 = vadd.f32 %v5419_v44, %v1180_v26  ;;  %v1194_v30 = vadd.f32 %v6478_v39, %v5399_v62  ;;  %vm1914_vm12 = vcmask 130048  }
 0x24c   :  { %v1687_v54 = vadd.f32 %v1686_v47, %v1521_v3  ;;  %v1539_v32 = vadd.f32 %v4014_v61, %v1351_v27  ;;  %v5498_v18 = vsel %vm1748_vm13, %v1675_v60, %v1764_v53  ;;  %v1767_v59 = vmul.f32 0.01, %v1693_v16 }
 0x24d   :  { %v1532_v10 = vpop.f32.mrf.mxu0  ;;  %vm1751_vm14 = vcmp.ge.f32.partialorder %v1693_v16, 0.0  ;;  %v1722_v60 = vpop.f32.mrf.mxu1  ;;  %v1399_v47 = vadd.f32 %v6479_v6, %v1201_v8  ;;  %v1391_v35 = vadd.f32 %v6480_v36, %v1194_v30  ;;  %v2191_v8 = vld [vmem:[%s6457_s3 + $0x18] sm:$0xff]  ;;  %vm2204_vm13 = vcmask 588800  }
 0x24e   :  { %v1705_v58 = vadd.f32 %v4048_v37, %v1539_v32  ;;  %v1533_v21 = vadd.f32 %v1532_v10, %v1343_v19  ;;  %v1783_v31 = vsel %vm1751_vm14, %v1693_v16, %v1767_v59  ;;  %v1766_v28 = vmul.f32 0.01, %v1687_v54 }
 0x24f   :  { %1818 = vrot.lane.b32.xlu1 %v5489_v12, %s4340_s27  ;;  %1812 = vrot.lane.b32.xlu0 %v5480_v55, %s4340_s27  ;;  %v4017_v20 = vpop.f32.mrf.mxu0  ;;  %vm1750_vm15 = vcmp.ge.f32.partialorder %v1687_v54, 0.0  ;;  %v4057_v16 = vpop.f32.mrf.mxu1  ;;  %v5646_v30 = vand.u32 4294901760, %v2191_v8 }
 0x250   :  { %v1699_v24 = vadd.f32 %v1698_v15, %v1533_v21  ;;  %v1551_v13 = vadd.f32 %v4017_v20, %v1367_v4  ;;  %v5513_v23 = vsel %vm1750_vm15, %v1687_v54, %v1766_v28  ;;  %v1769_v49 = vmul.f32 0.01, %v1705_v58  ;;  %v2196_v21 = vld [vmem:[%s6457_s3 + $0x40] sm:$0xff]  ;;  %v2194_v28 = vld [vmem:[%s6457_s3 + $0x30] sm:$0xff] }
 0x251   :  { %v1544_v40 = vpop.f32.mrf.mxu0  ;;  %vm1753_vm0 = vcmp.ge.f32.partialorder %v1705_v58, 0.0  ;;  %v1734_v27 = vpop.f32.mrf.mxu1  ;;  %v5588_v4 = vand.u32 4294901760, %v2194_v28 }
 0x252   :  { %v1717_v14 = vadd.f32 %v4051_v56, %v1551_v13  ;;  %v1545_v51 = vadd.f32 %v1544_v40, %v1359_v7  ;;  %v5521_v50 = vsel %vm1753_vm0, %v1705_v58, %v1769_v49  ;;  %v1768_v43 = vmul.f32 0.01, %v1699_v24  ;;  %v2193_v56 = vld [vmem:[%s6457_s3 + $0x28] sm:$0xff] }
 0x253   :  { %1862 = vrot.lane.b32.xlu1 %v5498_v18, %s4344_s2  ;;  %1864 = vrot.lane.b32.xlu0 %v5489_v12, %s4344_s2  ;;  %v4020_v5 = vpop.f32.mrf.mxu0  ;;  %vm1752_vm2 = vcmp.ge.f32.partialorder %v1699_v24, 0.0  ;;  %v5584_v40 = vand.u32 4294901760, %v2196_v21 }
 0x254   :  { %v1711_v41 = vadd.f32 %v1710_v42, %v1545_v51  ;;  %v1563_v22 = vadd.f32 %v4020_v5, %v1383_v52  ;;  %v5530_v63 = vsel %vm1752_vm2, %v1699_v24, %v1768_v43  ;;  %v1771_v57 = vmul.f32 0.01, %v1717_v14 }
 0x255   :  { %v1556_v25 = vpop.f32.mrf.mxu0  ;;  %vm1755_vm5 = vcmp.ge.f32.partialorder %v1717_v14, 0.0  ;;  %v5593_v24 = vand.u32 4294901760, %v2193_v56  ;;  %v5596_v13 = vsub.f32 %v2196_v21, %v5584_v40  ;;  %v5602_v5 = vsub.f32 %v2194_v28, %v5588_v4  ;;  %4058 = vmatprep.subr.mxu0 %v5584_v40 }
 0x256   :  { %v1557_v34 = vadd.f32 %v1556_v25, %v1375_v46  ;;  %v1729_v11 = vadd.f32 %v4054_v2, %v1563_v22  ;;  %v5541_v61 = vsel %vm1755_vm5, %v1717_v14, %v1771_v57  ;;  %v1770_v44 = vmul.f32 0.01, %v1711_v41  ;;  %4059 = vmatpush3.msra.mxu0 %v5584_v40  ;;  %v2192_v46 = vld [vmem:[%s6457_s3 + $0x20] sm:$0xff] }
 0x257   :  { %1822 = vrot.lane.b32.xlu1 %v1783_v31, %s4340_s27  ;;  %1816 = vrot.lane.b32.xlu0 %v5498_v18, %s4340_s27  ;;  %v4023_v48 = vpop.f32.mrf.mxu0  ;;  %vm1754_vm7 = vcmp.ge.f32.partialorder %v1711_v41, 0.0  ;;  %v5606_v0 = vsub.f32 %v2193_v56, %v5593_v24  ;;  %v5610_v7 = vand.u32 4294901760, %v5596_v13  ;;  %v5616_v14 = vand.u32 4294901760, %v5602_v5 }
 0x258   :  { %v1723_v62 = vadd.f32 %v1722_v60, %v1557_v34  ;;  %v1575_v3 = vadd.f32 %v4023_v48, %v1399_v47  ;;  %v5549_v10 = vsel %vm1754_vm7, %v1711_v41, %v1770_v44  ;;  %v1773_v1 = vmul.f32 0.01, %v1729_v11  ;;  %v2190_v60 = vld [vmem:[%s6457_s3 + $0x10] sm:$0xff] }
 0x259   :  { %v1568_v38 = vpop.f32.mrf.mxu0  ;;  %vm1757_vm8 = vcmp.ge.f32.partialorder %v1729_v11, 0.0  ;;  %v5620_v51 = vand.u32 4294901760, %v5606_v0  ;;  %v2505_v43 = vsub.f32 %v5596_v13, %v5610_v7  ;;  %v2519_v25 = vsub.f32 %v5602_v5, %v5616_v14 }
 0x25a   :  { %v1569_v53 = vadd.f32 %v1568_v38, %v1391_v35  ;;  %v1741_v37 = vadd.f32 %v4057_v16, %v1575_v3  ;;  %v5555_v32 = vsel %vm1757_vm8, %v1729_v11, %v1773_v1  ;;  %v1772_v59 = vmul.f32 0.01, %v1723_v62  ;;  %v2189_v38 = vld [vmem:[%s6457_s3 + $0x8] sm:$0xff]  ;;  %v2188_v16 = vld [vmem:[%s6457_s3] sm:$0xff] }
 0x25b   :  { %1866 = vrot.lane.b32.xlu1 %v5513_v23, %s4344_s2  ;;  %1868 = vrot.lane.b32.xlu0 %v1783_v31, %s4344_s2  ;;  %vm1756_vm9 = vcmp.ge.f32.partialorder %v1723_v62, 0.0  ;;  %v2195_v31 = vld [vmem:[%s6457_s3 + $0x38] sm:$0xff]  ;;  %v2506_v52 = vand.u32 4294901760, %v2505_v43  ;;  %v2526_v41 = vsub.f32 %v5606_v0, %v5620_v51  ;;  %v2520_v22 = vand.u32 4294901760, %v2519_v25  ;;  %s4345_s3 = smov 48  }
 0x25c   :  { %v1735_v54 = vadd.f32 %v1734_v27, %v1569_v53  ;;  %v5561_v20 = vsel %vm1756_vm9, %v1723_v62, %v1772_v59  ;;  %v1775_v9 = vmul.f32 0.01, %v1741_v37  ;;  %vm1759_vm10 = vcmp.ge.f32.partialorder %v1741_v37, 0.0 }
 0x25d   :  { %v5586_v33 = vand.u32 4294901760, %v2195_v31  ;;  %4100 = vmatprep.subr.mxu1 %v2506_v52  ;;  %v2527_v57 = vand.u32 4294901760, %v2526_v41  ;;  %v5638_v48 = vand.u32 4294901760, %v2192_v46  ;;  %v5657_v11 = vsub.f32 %v2191_v8, %v5646_v30 }
 0x25e   :  { %v1774_v19 = vmul.f32 0.01, %v1735_v54  ;;  %vm1758_vm11 = vcmp.ge.f32.partialorder %v1735_v54, 0.0  ;;  %v1791_v15 = vsel %vm1759_vm10, %v1741_v37, %v1775_v9  ;;  %4101 = vmatpush3.msra.mxu1 %v2506_v52  ;;  %v5659_v44 = vand.u32 4294901760, %v2190_v60 }
 0x25f   :  { %1870 = vrot.lane.b32.xlu1 %v5521_v50, %s4344_s2  ;;  %1820 = vrot.lane.b32.xlu0 %v5513_v23, %s4340_s27  ;;  %v5599_v49 = vsub.f32 %v2195_v31, %v5586_v33  ;;  %v5644_v39 = vsub.f32 %v2192_v46, %v5638_v48  ;;  %v5669_v47 = vand.u32 4294901760, %v5657_v11  ;;  %v5674_v35 = vand.u32 4294901760, %v2189_v38 }
 0x260   :  { %v5567_v58 = vsel %vm1758_vm11, %v1735_v54, %v1774_v19  ;;  %4060 = vmatprep.subr.mxu0 %v5586_v33  ;;  %v5672_v36 = vsub.f32 %v2190_v60, %v5659_v44  ;;  %v5690_v27 = vand.u32 4294901760, %v2188_v16 }
 0x261   :  { %v5613_v42 = vand.u32 4294901760, %v5599_v49  ;;  %4061 = vmatpush3.msra.mxu0 %v5586_v33  ;;  %v5654_v34 = vand.u32 4294901760, %v5644_v39  ;;  %v2540_v3 = vsub.f32 %v5657_v11, %v5669_v47  ;;  %v5687_v1 = vsub.f32 %v2189_v38, %v5674_v35 }
 0x262   :  { %4062 = vmatprep.subr.mxu0 %v5588_v4  ;;  %v5684_v53 = vand.u32 4294901760, %v5672_v36  ;;  %v5699_v9 = vsub.f32 %v2188_v16, %v5690_v27 }
 0x263   :  { %1824 = vrot.lane.b32.xlu1 %v5530_v63, %s4340_s27  ;;  %1826 = vrot.lane.b32.xlu0 %v5521_v50, %s4340_s27  ;;  %v2512_v26 = vsub.f32 %v5599_v49, %v5613_v42  ;;  %v2533_v6 = vsub.f32 %v5644_v39, %v5654_v34  ;;  %v2541_v37 = vand.u32 4294901760, %v2540_v3  ;;  %v5696_v59 = vand.u32 4294901760, %v5687_v1 }
 0x264   :  { %4063 = vmatpush3.msra.mxu0 %v5588_v4  ;;  %v2547_v54 = vsub.f32 %v5672_v36, %v5684_v53  ;;  %v5706_v21 = vand.u32 4294901760, %v5699_v9 }
 0x265   :  { %v2513_v2 = vand.u32 4294901760, %v2512_v26  ;;  %4064 = vmatprep.subr.mxu0 %v5593_v24  ;;  %v2534_v62 = vand.u32 4294901760, %v2533_v6 }
 0x266   :  { %4065 = vmatpush3.msra.mxu0 %v5593_v24  ;;  %v2548_v19 = vand.u32 4294901760, %v2547_v54  ;;  %v2561_v43 = vsub.f32 %v5699_v9, %v5706_v21 }
 0x267   :  { %1874 = vrot.lane.b32.xlu1 %v5541_v61, %s4344_s2  ;;  %1830 = vrot.lane.b32.xlu0 %v5541_v61, %s4340_s27 }
 0x268   :  { %4102 = vmatprep.subr.mxu1 %v2513_v2  ;;  %4066 = vmatprep.subr.mxu0 %v5638_v48  ;;  %v2562_v26 = vand.u32 4294901760, %v2561_v43 }
 0x269   :  { %4103 = vmatpush3.msra.mxu1 %v2513_v2  ;;  %4067 = vmatpush3.msra.mxu0 %v5638_v48 }
 0x26a   :  { %4104 = vmatprep.subr.mxu1 %v2520_v22  ;;  %4068 = vmatprep.subr.mxu0 %v5646_v30 }
 0x26b   :  { %1828 = vrot.lane.b32.xlu1 %v5549_v10, %s4340_s27  ;;  %1872 = vrot.lane.b32.xlu0 %v5549_v10, %s4344_s2 }
 0x26c   :  { %4105 = vmatpush3.msra.mxu1 %v2520_v22  ;;  %4069 = vmatpush3.msra.mxu0 %v5646_v30 }
 0x26d   :  { %4106 = vmatprep.subr.mxu1 %v2527_v57  ;;  %4070 = vmatprep.subr.mxu0 %v5659_v44 }
 0x26e   :  { %4107 = vmatpush3.msra.mxu1 %v2527_v57  ;;  %4071 = vmatpush3.msra.mxu0 %v5659_v44 }
 0x26f   :  { %1878 = vrot.lane.b32.xlu1 %v5555_v32, %s4344_s2  ;;  %1834 = vrot.lane.b32.xlu0 %v5555_v32, %s4340_s27 }
 0x270   :  { %4072 = vmatprep.subr.mxu0 %v5674_v35  ;;  %4108 = vmatprep.subr.mxu1 %v2534_v62 }
 0x271   :  { %4073 = vmatpush3.msra.mxu0 %v5674_v35  ;;  %4109 = vmatpush3.msra.mxu1 %v2534_v62 }
 0x272   :  { %4074 = vmatprep.subr.mxu0 %v5690_v27  ;;  %4110 = vmatprep.subr.mxu1 %v2541_v37 }
 0x273   :  { %1832 = vrot.lane.b32.xlu1 %v5561_v20, %s4340_s27  ;;  %1876 = vrot.lane.b32.xlu0 %v5561_v20, %s4344_s2 }
 0x274   :  { %4075 = vmatpush3.msra.mxu0 %v5690_v27  ;;  %4111 = vmatpush3.msra.mxu1 %v2541_v37 }
 0x275   :  { %4142 = vmatprep.subr.mxu0 %v5596_v13  ;;  %4112 = vmatprep.subr.mxu1 %v2548_v19 }
 0x276   :  { %4113 = vmatpush3.msra.mxu1 %v2548_v19 }
 0x277   :  { %1882 = vrot.lane.b32.xlu1 %v1791_v15, %s4344_s2  ;;  %1880 = vrot.lane.b32.xlu0 %v5567_v58, %s4344_s2 }
 0x27b   :  { %1836 = vrot.lane.b32.xlu1 %v5567_v58, %s4340_s27  ;;  %1838 = vrot.lane.b32.xlu0 %v1791_v15, %s4340_s27  ;;  %v2554_v15 = vsub.f32 %v5687_v1, %v5696_v59 }
 0x27d   :  { %v2555_v56 = vand.u32 4294901760, %v2554_v15 }
 0x27f   :  { %4114 = vmatprep.subr.mxu1 %v2555_v56 }
 0x280   :  { %4115 = vmatpush3.msra.mxu1 %v2555_v56 }
 0x281   :  { %4116 = vmatprep.subr.mxu1 %v2562_v26 }
 0x282   :  { %4117 = vmatpush3.msra.mxu1 %v2562_v26 }
 0x283   :  { %4184 = vmatprep.subr.mxu1 %v5584_v40 }
 0x2b5   :  { %v1857_v31 = vpop.permute.xlu0 %1856  ;;  %v1811_v28 = vpop.permute.xlu1 %1810 }
 0x2b6   :  { %v1899_v57 = vsel %vm259_vm1, %v5471_v45, %v1811_v28 }
 0x2b9   :  { %v1815_v25 = vpop.permute.xlu1 %1814  ;;  %v1809_v52 = vpop.permute.xlu0 %1808 }
 0x2ba   :  { %v1898_v2 = vsel %vm259_vm1, %v5471_v45, %v1809_v52  ;;  %v1901_v19 = vsel %vm259_vm1, %v5480_v55, %v1815_v25 }
 0x2bb   :  { %v5714_v41 = vsel %vm1914_vm12, %v1898_v2, %v1857_v31 }
 0x2bc   :  { %2043 = vrot.lane.b32.xlu0 %v5714_v41, %s4343_s1  ;;  %v1995_v22 = vrot.slane %v5714_v41, 1 }
 0x2bd   :  { %v1859_v46 = vpop.permute.xlu1 %1858  ;;  %v1861_v8 = vpop.permute.xlu0 %1860 }
 0x2be   :  { %v5723_v60 = vsel %vm1914_vm12, %v1899_v57, %v1859_v46  ;;  %v2027_v38 = vsel %vm373_vm3, %v1995_v22, %v5714_v41 }
 0x2bf   :  { %2045 = vrot.lane.b32.xlu1 %v5723_v60, %s4343_s1  ;;  %v1996_v6 = vrot.slane %v5723_v60, 1 }
 0x2c0   :  { %2107 = vrot.lane.b32.xlu0 %v2027_v38, %s4345_s3 }
 0x2c1   :  { %v1819_v16 = vpop.permute.xlu1 %1818  ;;  %v1813_v62 = vpop.permute.xlu0 %1812  ;;  %v2028_v45 = vsel %vm373_vm3, %v1996_v6, %v5723_v60 }
 0x2c2   :  { %v1900_v3 = vsel %vm259_vm1, %v5460_v29, %v1813_v62  ;;  %v1903_v38 = vsel %vm259_vm1, %v5498_v18, %v1819_v16 }
 0x2c3   :  { %v5736_v37 = vsel %vm1914_vm12, %v1900_v3, %v1861_v8  ;;  %2109 = vrot.lane.b32.xlu1 %v2028_v45, %s4345_s3 }
 0x2c4   :  { %2047 = vrot.lane.b32.xlu0 %v5736_v37, %s4343_s1  ;;  %v1997_v54 = vrot.slane %v5736_v37, 1 }
 0x2c5   :  { %v1863_v15 = vpop.permute.xlu1 %1862  ;;  %v1865_v31 = vpop.permute.xlu0 %1864 }
 0x2c6   :  { %v5745_v28 = vsel %vm1914_vm12, %v1901_v19, %v1863_v15  ;;  %v2029_v29 = vsel %vm373_vm3, %v1997_v54, %v5736_v37 }
 0x2c7   :  { %2049 = vrot.lane.b32.xlu1 %v5745_v28, %s4343_s1  ;;  %v1998_v56 = vrot.slane %v5745_v28, 1 }
 0x2c8   :  { %2111 = vrot.lane.b32.xlu0 %v2029_v29, %s4345_s3 }
 0x2c9   :  { %v1823_v43 = vpop.permute.xlu1 %1822  ;;  %v1817_v26 = vpop.permute.xlu0 %1816  ;;  %v2030_v55 = vsel %vm373_vm3, %v1998_v56, %v5745_v28 }
 0x2ca   :  { %v1902_v25 = vsel %vm259_vm1, %v5469_v17, %v1817_v26  ;;  %v1905_v22 = vsel %vm259_vm1, %v5513_v23, %v1823_v43 }
 0x2cb   :  { %v5758_v52 = vsel %vm1914_vm12, %v1902_v25, %v1865_v31  ;;  %2113 = vrot.lane.b32.xlu1 %v2030_v55, %s4345_s3 }
 0x2cc   :  { %2051 = vrot.lane.b32.xlu0 %v5758_v52, %s4343_s1  ;;  %v1999_v2 = vrot.slane %v5758_v52, 1 }
 0x2cd   :  { %v1867_v57 = vpop.permute.xlu1 %1866  ;;  %v1869_v46 = vpop.permute.xlu0 %1868 }
 0x2ce   :  { %v5767_v8 = vsel %vm1914_vm12, %v1905_v22, %v1869_v46  ;;  %v2031_v17 = vsel %vm373_vm3, %v1999_v2, %v5758_v52  ;;  %v5777_v23 = vsel %vm1914_vm12, %v1903_v38, %v1867_v57 }
 0x2cf   :  { %2057 = vrot.lane.b32.xlu1 %v5767_v8, %s4343_s1  ;;  %v2002_v3 = vrot.slane %v5767_v8, 1  ;;  %v2000_v29 = vrot.slane %v5777_v23, 1 }
 0x2d0   :  { %2115 = vrot.lane.b32.xlu0 %v2031_v17, %s4345_s3 }
 0x2d1   :  { %v1871_v6 = vpop.permute.xlu1 %1870  ;;  %v1821_v62 = vpop.permute.xlu0 %1820  ;;  %v2032_v55 = vsel %vm373_vm3, %v2000_v29, %v5777_v23 }
 0x2d2   :  { %v1904_v45 = vsel %vm259_vm1, %v5489_v12, %v1821_v62  ;;  %v2034_v12 = vsel %vm373_vm3, %v2002_v3, %v5767_v8 }
 0x2d3   :  { %v5783_v54 = vsel %vm1914_vm12, %v1904_v45, %v1869_v46  ;;  %2053 = vrot.lane.b32.xlu1 %v5777_v23, %s4343_s1 }
 0x2d4   :  { %2055 = vrot.lane.b32.xlu0 %v5783_v54, %s4343_s1  ;;  %v2001_v18 = vrot.slane %v5783_v54, 1 }
 0x2d5   :  { %v1825_v16 = vpop.permute.xlu1 %1824  ;;  %v1827_v19 = vpop.permute.xlu0 %1826 }
 0x2d6   :  { %v1906_v15 = vsel %vm259_vm1, %v5530_v63, %v1825_v16  ;;  %v2033_v31 = vsel %vm373_vm3, %v2001_v18, %v5783_v54  ;;  %v1907_v2 = vsel %vm259_vm1, %v5530_v63, %v1827_v19 }
 0x2d7   :  { %2121 = vrot.lane.b32.xlu1 %v2034_v12, %s4345_s3  ;;  %v5799_v56 = vsel %vm1914_vm12, %v1906_v15, %v1871_v6 }
 0x2d8   :  { %2119 = vrot.lane.b32.xlu0 %v2033_v31, %s4345_s3  ;;  %v2003_v25 = vrot.slane %v5799_v56, 1 }
 0x2d9   :  { %v1875_v43 = vpop.permute.xlu1 %1874  ;;  %v1831_v26 = vpop.permute.xlu0 %1830 }
 0x2da   :  { %v2035_v38 = vsel %vm373_vm3, %v2003_v25, %v5799_v56  ;;  %v1909_v18 = vsel %vm259_vm1, %v5549_v10, %v1831_v26 }
 0x2db   :  { %2117 = vrot.lane.b32.xlu1 %v2032_v55, %s4345_s3 }
 0x2dc   :  { %2059 = vrot.lane.b32.xlu0 %v5799_v56, %s4343_s1 }
 0x2dd   :  { %v1829_v22 = vpop.permute.xlu1 %1828  ;;  %v1873_v57 = vpop.permute.xlu0 %1872 }
 0x2de   :  { %v1908_v46 = vsel %vm259_vm1, %v5521_v50, %v1829_v22  ;;  %v5813_v17 = vsel %vm1914_vm12, %v1907_v2, %v1873_v57 }
 0x2df   :  { %2061 = vrot.lane.b32.xlu1 %v5813_v17, %s4343_s1  ;;  %v2004_v6 = vrot.slane %v5813_v17, 1  ;;  %v5821_v62 = vsel %vm1914_vm12, %v1908_v46, %v1875_v43 }
 0x2e0   :  { %2123 = vrot.lane.b32.xlu0 %v2035_v38, %s4345_s3  ;;  %v2005_v3 = vrot.slane %v5821_v62, 1 }
 0x2e1   :  { %v1879_v63 = vpop.permute.xlu1 %1878  ;;  %v1835_v45 = vpop.permute.xlu0 %1834  ;;  %v2036_v50 = vsel %vm373_vm3, %v2004_v6, %v5813_v17 }
 0x2e2   :  { %v2037_v31 = vsel %vm373_vm3, %v2005_v3, %v5821_v62  ;;  %v1911_v46 = vsel %vm259_vm1, %v5561_v20, %v1835_v45 }
 0x2e3   :  { %2125 = vrot.lane.b32.xlu1 %v2036_v50, %s4345_s3 }
 0x2e4   :  { %2063 = vrot.lane.b32.xlu0 %v5821_v62, %s4343_s1 }
 0x2e5   :  { %v1833_v16 = vpop.permute.xlu1 %1832  ;;  %v1877_v19 = vpop.permute.xlu0 %1876 }
 0x2e6   :  { %v1910_v15 = vsel %vm259_vm1, %v5541_v61, %v1833_v16  ;;  %v5835_v12 = vsel %vm1914_vm12, %v1909_v18, %v1877_v19  ;;  %v1947_v16 = vrot.slane %v5714_v41, 7 }
 0x2e7   :  { %2065 = vrot.lane.b32.xlu1 %v5835_v12, %s4343_s1  ;;  %v2006_v29 = vrot.slane %v5835_v12, 1  ;;  %v5843_v43 = vsel %vm1914_vm12, %v1910_v15, %v1879_v63  ;;  %v1948_v15 = vrot.slane %v5723_v60, 7 }
 0x2e8   :  { %2127 = vrot.lane.b32.xlu0 %v2037_v31, %s4345_s3  ;;  %v2007_v55 = vrot.slane %v5843_v43, 1  ;;  %v1979_v31 = vsel %vm324_vm4, %v5714_v41, %v1947_v16 }
 0x2e9   :  { %v1883_v10 = vpop.permute.xlu1 %1882  ;;  %v1881_v26 = vpop.permute.xlu0 %1880  ;;  %v2038_v61 = vsel %vm373_vm3, %v2006_v29, %v5835_v12 }
 0x2ea   :  { %v2039_v6 = vsel %vm373_vm3, %v2007_v55, %v5843_v43  ;;  %v5864_v63 = vsel %vm1914_vm12, %v1911_v46, %v1881_v26  ;;  %v1980_v55 = vsel %vm324_vm4, %v5723_v60, %v1948_v15  ;;  %v1949_v46 = vrot.slane %v5736_v37, 7 }
 0x2eb   :  { %2129 = vrot.lane.b32.xlu1 %v2038_v61, %s4345_s3  ;;  %v2008_v20 = vrot.slane %v5864_v63, 1  ;;  %v1950_v60 = vrot.slane %v5745_v28, 7 }
 0x2ec   :  { %2067 = vrot.lane.b32.xlu0 %v5843_v43, %s4343_s1 }
 0x2ed   :  { %v1837_v25 = vpop.permute.xlu1 %1836  ;;  %v1839_v2 = vpop.permute.xlu0 %1838  ;;  %v2040_v45 = vsel %vm373_vm3, %v2008_v20, %v5864_v63 }
 0x2ee   :  { %v1912_v22 = vsel %vm259_vm1, %v5555_v32, %v1837_v25  ;;  %v1913_v57 = vsel %vm259_vm1, %v5567_v58, %v1839_v2  ;;  %vm2171_vm1 = vcmask 392192  }
 0x2ef   :  { %v5859_v38 = vsel %vm1914_vm12, %v1913_v57, %v1883_v10  ;;  %v5867_v50 = vsel %vm1914_vm12, %v1912_v22, %v1883_v10 }
 0x2f0   :  { %2131 = vrot.lane.b32.xlu0 %v2039_v6, %s4345_s3  ;;  %2073 = vrot.lane.b32.xlu1 %v5859_v38, %s4343_s1  ;;  %v2009_v32 = vrot.slane %v5867_v50, 1  ;;  %v2010_v3 = vrot.slane %v5859_v38, 1 }
 0x2f2   :  { %v2041_v58 = vsel %vm373_vm3, %v2009_v32, %v5867_v50  ;;  %v2042_v18 = vsel %vm373_vm3, %v2010_v3, %v5859_v38 }
 0x2f4   :  { %2071 = vrot.lane.b32.xlu0 %v5867_v50, %s4343_s1  ;;  %2069 = vrot.lane.b32.xlu1 %v5864_v63, %s4343_s1 }
 0x2f8   :  { %2135 = vrot.lane.b32.xlu0 %v2041_v58, %s4345_s3  ;;  %2133 = vrot.lane.b32.xlu1 %v2040_v45, %s4345_s3  ;;  %v1981_v45 = vsel %vm324_vm4, %v5736_v37, %v1949_v46 }
 0x2fc   :  { %2137 = vrot.lane.b32.xlu1 %v2042_v18, %s4345_s3 }
 0x32e   :  { %v2044_v19 = vpop.permute.xlu0 %2043 }
 0x32f   :  { %v2155_v10 = vsel %vm519_vm6, %v1979_v31, %v2044_v19 }
 0x331   :  { %v2046_v29 = vpop.permute.xlu1 %2045 }
 0x332   :  { %v2108_v26 = vpop.permute.xlu0 %2107  ;;  %v2156_v2 = vsel %vm519_vm6, %v1980_v55, %v2046_v29 }
 0x333   :  { %v2172_v61 = vsel %vm2171_vm1, %v2155_v10, %v2108_v26  ;;  %v1982_v10 = vsel %vm324_vm4, %v5745_v28, %v1950_v60 }
 0x334   :  { %v2206_v25 = vsel %vm2204_vm13, %v2172_v61, 0 }
 0x335   :  { %v5898_v22 = vand.u32 4294901760, %v2206_v25  ;;  %v2110_v57 = vpop.permute.xlu1 %2109 }
 0x336   :  { %v2173_v41 = vsel %vm2171_vm1, %v2156_v2, %v2110_v57  ;;  %v2048_v6 = vpop.permute.xlu0 %2047  ;;  %v1951_v2 = vrot.slane %v5758_v52, 7 }
 0x337   :  { %v5903_v32 = vsub.f32 %v2206_v25, %v5898_v22  ;;  %v2209_v20 = vsel %vm2204_vm13, %v2173_v41, 0  ;;  %4118 = vmatprep.mubr.f32.mxu1 %v5898_v22  ;;  %v2157_v19 = vsel %vm519_vm6, %v1981_v45, %v2048_v6 }
 0x338   :  { %v5908_v58 = vand.u32 4294901760, %v2209_v20 }
 0x339   :  { %v2050_v3 = vpop.permute.xlu1 %2049  ;;  %v2329_v18 = vand.u32 4294901760, %v5903_v32 }
 0x33a   :  { %v5914_v16 = vsub.f32 %v2209_v20, %v5908_v58  ;;  %4119 = vmatmul.mubr.f32.vlgmr.msra.gmra.mxu1 %v5908_v58  ;;  %v2112_v15 = vpop.permute.xlu0 %2111  ;;  %v2158_v61 = vsel %vm519_vm6, %v1982_v10, %v2050_v3  ;;  %v1983_v3 = vsel %vm324_vm4, %v5758_v52, %v1951_v2 }
 0x33b   :  { %v2174_v31 = vsel %vm2171_vm1, %v2157_v19, %v2112_v15  ;;  %v2330_v29 = vsub.f32 %v5903_v32, %v2329_v18  ;;  %4185 = vmatpush3.msra.mxu1 %v5584_v40 }
 0x33c   :  { %v6472_v37 = vand.u32 4294901760, %v5914_v16  ;;  %v2212_v26 = vsel %vm2204_vm13, %v2174_v31, 0  ;;  %4186 = vmatprep.subr.mxu1 %v5586_v33 }
 0x33d   :  { %v5929_v55 = vand.u32 4294901760, %v2212_v26  ;;  %v2114_v25 = vpop.permute.xlu1 %2113  ;;  %v2331_v57 = vand.u32 4294901760, %v2330_v29  ;;  %4187 = vmatpush3.msra.mxu1 %v5586_v33 }
 0x33e   :  { %v2340_v46 = vsub.f32 %v5914_v16, %v6472_v37  ;;  %v2175_v28 = vsel %vm2171_vm1, %v2158_v61, %v2114_v25  ;;  %v2052_v41 = vpop.permute.xlu0 %2051  ;;  %4188 = vmatprep.subr.mxu1 %v5588_v4  ;;  %v1954_v61 = vrot.slane %v5767_v8, 7 }
 0x33f   :  { %v5939_v6 = vsub.f32 %v2212_v26, %v5929_v55  ;;  %v2215_v20 = vsel %vm2204_vm13, %v2175_v28, 0  ;;  %4076 = vmatprep.mubr.f32.mxu0 %v2331_v57  ;;  %4121 = vmatprep.mubr.f32.mxu1 %v5929_v55  ;;  %v2159_v29 = vsel %vm519_vm6, %v1983_v3, %v2052_v41  ;;  %v1953_v28 = vrot.slane %v5783_v54, 7 }
 0x340   :  { %v2341_v60 = vand.u32 4294901760, %v2340_v46  ;;  %v5943_v45 = vand.u32 4294901760, %v2215_v20  ;;  %4189 = vmatpush3.msra.mxu1 %v5588_v4  ;;  %v1952_v3 = vrot.slane %v5777_v23, 7 }
 0x341   :  { %v2058_v19 = vpop.permute.xlu1 %2057  ;;  %v6470_v15 = vand.u32 4294901760, %v5939_v6  ;;  %4190 = vmatprep.subr.mxu1 %v5593_v24 }
 0x342   :  { %v5951_v31 = vsub.f32 %v2215_v20, %v5943_v45  ;;  %4077 = vmatmul.mubr.f32.vlgmr.msra.gmra.mxu0 %v2341_v60  ;;  %4122 = vmatmul.mubr.f32.gmra.mxu1 %v5943_v45  ;;  %v2116_v10 = vpop.permute.xlu0 %2115 }
 0x343   :  { %v2176_v26 = vsel %vm2171_vm1, %v2159_v29, %v2116_v10  ;;  %v2350_v52 = vsub.f32 %v5939_v6, %v6470_v15  ;;  %4143 = vmatpush3.msra.mxu0 %v5596_v13  ;;  %4191 = vmatpush3.msra.mxu1 %v5593_v24 }
 0x344   :  { %v2218_v25 = vsel %vm2204_vm13, %v2176_v26, 0  ;;  %v6469_v2 = vand.u32 4294901760, %v5951_v31  ;;  %4144 = vmatprep.subr.mxu0 %v5599_v49  ;;  %4192 = vmatprep.subr.mxu1 %v5638_v48  ;;  %v1985_v26 = vsel %vm324_vm4, %v5783_v54, %v1953_v28  ;;  %v1984_v28 = vsel %vm324_vm4, %v5777_v23, %v1952_v3 }
 0x345   :  { %v5966_v57 = vand.u32 4294901760, %v2218_v25  ;;  %v2054_v46 = vpop.permute.xlu1 %2053  ;;  %v2351_v41 = vand.u32 4294901760, %v2350_v52  ;;  %4145 = vmatpush3.msra.mxu0 %v5599_v49  ;;  %4193 = vmatpush3.msra.mxu1 %v5638_v48  ;;  %v1986_v49 = vsel %vm324_vm4, %v5767_v8, %v1954_v61 }
 0x346   :  { %v2056_v13 = vpop.permute.xlu0 %2055  ;;  %v2360_v20 = vsub.f32 %v5951_v31, %v6469_v2  ;;  %4146 = vmatprep.subr.mxu0 %v5602_v5  ;;  %4194 = vmatprep.subr.mxu1 %v5646_v30  ;;  %v2162_v10 = vsel %vm519_vm6, %v1986_v49, %v2058_v19  ;;  %v2160_v49 = vsel %vm519_vm6, %v1984_v28, %v2054_v46 }
 0x347   :  { %v5977_v60 = vsub.f32 %v2218_v25, %v5966_v57  ;;  %4079 = vmatprep.mubr.f32.mxu0 %v2351_v41  ;;  %4124 = vmatprep.mubr.f32.mxu1 %v5966_v57  ;;  %v2161_v41 = vsel %vm519_vm6, %v1985_v26, %v2056_v13 }
 0x348   :  { %v2361_v29 = vand.u32 4294901760, %v2360_v20  ;;  %4147 = vmatpush3.msra.mxu0 %v5602_v5  ;;  %4195 = vmatpush3.msra.mxu1 %v5646_v30 }
 0x349   :  { %v2122_v52 = vpop.permute.xlu1 %2121  ;;  %v6468_v25 = vand.u32 4294901760, %v5977_v60  ;;  %4148 = vmatprep.subr.mxu0 %v5606_v0  ;;  %4196 = vmatprep.subr.mxu1 %v5659_v44 }
 0x34a   :  { %v2179_v8 = vsel %vm2171_vm1, %v2162_v10, %v2122_v52  ;;  %4080 = vmatmul.mubr.f32.gmra.mxu0 %v2361_v29  ;;  %v2120_v5 = vpop.permute.xlu0 %2119  ;;  %4197 = vmatpush3.msra.mxu1 %v5659_v44 }
 0x34b   :  { %v2227_v19 = vsel %vm2204_vm13, %v2179_v8, 0  ;;  %v2178_v61 = vsel %vm2171_vm1, %v2161_v41, %v2120_v5  ;;  %v2370_v54 = vsub.f32 %v5977_v60, %v6468_v25  ;;  %4149 = vmatpush3.msra.mxu0 %v5606_v0  ;;  %4198 = vmatprep.subr.mxu1 %v5674_v35  ;;  %v1955_v0 = vrot.slane %v5799_v56, 7 }
 0x34c   :  { %v6003_v13 = vand.u32 4294901760, %v2227_v19  ;;  %v2224_v20 = vsel %vm2204_vm13, %v2178_v61, 0  ;;  %4150 = vmatprep.subr.mxu0 %v5644_v39  ;;  %4199 = vmatpush3.msra.mxu1 %v5674_v35  ;;  %v1956_v41 = vrot.slane %v5813_v17, 7 }
 0x34d   :  { %v6009_v29 = vand.u32 4294901760, %v2224_v20  ;;  %v2118_v10 = vpop.permute.xlu1 %2117  ;;  %v2371_v26 = vand.u32 4294901760, %v2370_v54  ;;  %4151 = vmatpush3.msra.mxu0 %v5644_v39  ;;  %4200 = vmatprep.subr.mxu1 %v5690_v27  ;;  %v1987_v5 = vsel %vm324_vm4, %v5799_v56, %v1955_v0 }
 0x34e   :  { %v2177_v23 = vsel %vm2171_vm1, %v2160_v49, %v2118_v10  ;;  %v2060_v3 = vpop.permute.xlu0 %2059  ;;  %4152 = vmatprep.subr.mxu0 %v5657_v11  ;;  %4201 = vmatpush3.msra.mxu1 %v5690_v27  ;;  %v6024_v39 = vsub.f32 %v2227_v19, %v6003_v13  ;;  %v1988_v56 = vsel %vm324_vm4, %v5813_v17, %v1956_v41 }
 0x34f   :  { %v6018_v52 = vsub.f32 %v2224_v20, %v6009_v29  ;;  %v2221_v46 = vsel %vm2204_vm13, %v2177_v23, 0  ;;  %4082 = vmatprep.mubr.f32.mxu0 %v2371_v26  ;;  %4153 = vmatpush3.msra.mxu0 %v5657_v11  ;;  %v2163_v19 = vsel %vm519_vm6, %v1987_v5, %v2060_v3  ;;  %v1957_v3 = vrot.slane %v5821_v62, 7 }
 0x350   :  { %v6026_v8 = vand.u32 4294901760, %v2221_v46  ;;  %4154 = vmatprep.subr.mxu0 %v5672_v36  ;;  %4268 = vmatprep.subr.mxu1 %v5584_v40  ;;  %v6464_v10 = vand.u32 4294901760, %v6024_v39 }
 0x351   :  { %v2062_v61 = vpop.permute.xlu1 %2061  ;;  %v6462_v54 = vand.u32 4294901760, %v6018_v52  ;;  %4155 = vmatpush3.msra.mxu0 %v5672_v36 }
 0x352   :  { %v6035_v11 = vsub.f32 %v2221_v46, %v6026_v8  ;;  %4125 = vmatmul.mubr.f32.gmra.mxu1 %v6026_v8  ;;  %v2124_v28 = vpop.permute.xlu0 %2123  ;;  %4156 = vmatprep.subr.mxu0 %v5687_v1  ;;  %v2164_v0 = vsel %vm519_vm6, %v1988_v56, %v2062_v61  ;;  %v1989_v56 = vsel %vm324_vm4, %v5821_v62, %v1957_v3 }
 0x353   :  { %v2180_v20 = vsel %vm2171_vm1, %v2163_v19, %v2124_v28  ;;  %4127 = vmatprep.mubr.f32.mxu1 %v6009_v29  ;;  %4157 = vmatpush3.msra.mxu0 %v5687_v1  ;;  %v2390_v1 = vsub.f32 %v6018_v52, %v6462_v54 }
 0x354   :  { %v2230_v36 = vsel %vm2204_vm13, %v2180_v20, 0  ;;  %v6463_v49 = vand.u32 4294901760, %v6035_v11  ;;  %4158 = vmatprep.subr.mxu0 %v5699_v9  ;;  %v2400_v20 = vsub.f32 %v6024_v39, %v6464_v10 }
 0x355   :  { %v6050_v26 = vand.u32 4294901760, %v2230_v36  ;;  %v2126_v23 = vpop.permute.xlu1 %2125  ;;  %4159 = vmatpush3.msra.mxu0 %v5699_v9  ;;  %v1958_v9 = vrot.slane %v5835_v12, 7 }
 0x356   :  { %v2181_v17 = vsel %vm2171_vm1, %v2164_v0, %v2126_v23  ;;  %4128 = vmatmul.mubr.f32.gmra.mxu1 %v6003_v13  ;;  %v2064_v46 = vpop.permute.xlu0 %2063  ;;  %v2380_v41 = vsub.f32 %v6035_v11, %v6463_v49  ;;  %4226 = vmatprep.subr.mxu0 %v5610_v7  ;;  %v2391_v23 = vand.u32 4294901760, %v2390_v1 }
 0x357   :  { %v6064_v5 = vsub.f32 %v2230_v36, %v6050_v26  ;;  %v2233_v61 = vsel %vm2204_vm13, %v2181_v17, 0  ;;  %4130 = vmatprep.mubr.f32.mxu1 %v6050_v26  ;;  %v2165_v54 = vsel %vm519_vm6, %v1989_v56, %v2064_v46  ;;  %v1990_v3 = vsel %vm324_vm4, %v5835_v12, %v1958_v9 }
 0x358   :  { %v6069_v19 = vand.u32 4294901760, %v2233_v61  ;;  %v2381_v28 = vand.u32 4294901760, %v2380_v41 }
 0x359   :  { %v2066_v0 = vpop.permute.xlu1 %2065  ;;  %v6465_v36 = vand.u32 4294901760, %v6064_v5 }
 0x35a   :  { %v6078_v17 = vsub.f32 %v2233_v61, %v6069_v19  ;;  %4083 = vmatmul.mubr.f32.gmra.mxu0 %v2381_v28  ;;  %4131 = vmatmul.mubr.f32.gmra.mxu1 %v6069_v19  ;;  %v2128_v41 = vpop.permute.xlu0 %2127  ;;  %v2401_v61 = vand.u32 4294901760, %v2400_v20  ;;  %v2166_v46 = vsel %vm519_vm6, %v1990_v3, %v2066_v0 }
 0x35b   :  { %v2182_v49 = vsel %vm2171_vm1, %v2165_v54, %v2128_v41  ;;  %4085 = vmatprep.mubr.f32.mxu0 %v2391_v23  ;;  %v2410_v62 = vsub.f32 %v6064_v5, %v6465_v36  ;;  %v1959_v54 = vrot.slane %v5843_v43, 7 }
 0x35c   :  { %v2236_v1 = vsel %vm2204_vm13, %v2182_v49, 0  ;;  %v6466_v10 = vand.u32 4294901760, %v6078_v17 }
 0x35d   :  { %v6091_v28 = vand.u32 4294901760, %v2236_v1  ;;  %v2130_v56 = vpop.permute.xlu1 %2129  ;;  %v2411_v23 = vand.u32 4294901760, %v2410_v62  ;;  %v1991_v62 = vsel %vm324_vm4, %v5843_v43, %v1959_v54 }
 0x35e   :  { %v2183_v41 = vsel %vm2171_vm1, %v2166_v46, %v2130_v56  ;;  %4086 = vmatmul.mubr.f32.gmra.mxu0 %v2401_v61  ;;  %v2068_v36 = vpop.permute.xlu0 %2067  ;;  %v2420_v12 = vsub.f32 %v6078_v17, %v6466_v10 }
 0x35f   :  { %v6099_v49 = vsub.f32 %v2236_v1, %v6091_v28  ;;  %v2239_v9 = vsel %vm2204_vm13, %v2183_v41, 0  ;;  %4088 = vmatprep.mubr.f32.mxu0 %v2411_v23  ;;  %4133 = vmatprep.mubr.f32.mxu1 %v6091_v28  ;;  %v2167_v46 = vsel %vm519_vm6, %v1991_v62, %v2068_v36  ;;  %v1961_v36 = vrot.slane %v5867_v50, 7 }
 0x360   :  { %v6103_v20 = vand.u32 4294901760, %v2239_v9  ;;  %v2421_v0 = vand.u32 4294901760, %v2420_v12  ;;  %v1960_v12 = vrot.slane %v5864_v63, 7 }
 0x361   :  { %v6467_v3 = vand.u32 4294901760, %v6099_v49 }
 0x362   :  { %v6109_v61 = vsub.f32 %v2239_v9, %v6103_v20  ;;  %v2074_v1 = vpop.permute.xlu1 %2073  ;;  %4089 = vmatmul.mubr.f32.gmra.mxu0 %v2421_v0  ;;  %4134 = vmatmul.mubr.f32.gmra.mxu1 %v6103_v20  ;;  %v2132_v56 = vpop.permute.xlu0 %2131  ;;  %v1992_v25 = vsel %vm324_vm4, %v5864_v63, %v1960_v12 }
 0x363   :  { %v2184_v23 = vsel %vm2171_vm1, %v2167_v46, %v2132_v56  ;;  %v2430_v41 = vsub.f32 %v6099_v49, %v6467_v3  ;;  %v1962_v3 = vrot.slane %v5859_v38, 7 }
 0x364   :  { %v2242_v43 = vsel %vm2204_vm13, %v2184_v23, 0  ;;  %v6471_v54 = vand.u32 4294901760, %v6109_v61 }
 0x365   :  { %v6120_v9 = vand.u32 4294901760, %v2242_v43  ;;  %v2431_v0 = vand.u32 4294901760, %v2430_v41  ;;  %v1993_v41 = vsel %vm324_vm4, %v5867_v50, %v1961_v36 }
 0x366   :  { %v2070_v62 = vpop.permute.xlu1 %2069  ;;  %v2072_v10 = vpop.permute.xlu0 %2071  ;;  %v2440_v46 = vsub.f32 %v6109_v61, %v6471_v54 }
 0x367   :  { %v6127_v56 = vsub.f32 %v2242_v43, %v6120_v9  ;;  %4091 = vmatprep.mubr.f32.mxu0 %v2431_v0  ;;  %4136 = vmatprep.mubr.f32.mxu1 %v6120_v9  ;;  %v2168_v15 = vsel %vm519_vm6, %v1992_v25, %v2070_v62  ;;  %v2169_v54 = vsel %vm519_vm6, %v1993_v41, %v2072_v10 }
 0x368   :  { %v2441_v23 = vand.u32 4294901760, %v2440_v46  ;;  %v1994_v25 = vsel %vm324_vm4, %v5859_v38, %v1962_v3 }
 0x369   :  { %v2449_v2 = vand.u32 4294901760, %v6127_v56 }
 0x36a   :  { %v2134_v43 = vpop.permute.xlu1 %2133  ;;  %4092 = vmatmul.mubr.f32.gmra.mxu0 %v2441_v23  ;;  %v2136_v0 = vpop.permute.xlu0 %2135 }
 0x36b   :  { %v2185_v37 = vsel %vm2171_vm1, %v2168_v15, %v2134_v43  ;;  %v2186_v46 = vsel %vm2171_vm1, %v2169_v54, %v2136_v0  ;;  %v2450_v63 = vsub.f32 %v6127_v56, %v2449_v2  ;;  %v2170_v15 = vsel %vm519_vm6, %v1994_v25, %v2074_v1 }
 0x36c   :  { %v2245_v12 = vsel %vm2204_vm13, %v2185_v37, 0  ;;  %v2248_v50 = vsel %vm2204_vm13, %v2186_v46, 0 }
 0x36d   :  { %v6147_v36 = vand.u32 4294901760, %v2245_v12  ;;  %v6149_v10 = vand.u32 4294901760, %v2248_v50  ;;  %v2451_v62 = vand.u32 4294901760, %v2450_v63 }
 0x36e   :  { %v2138_v23 = vpop.permute.xlu1 %2137 }
 0x36f   :  { %v6153_v54 = vsub.f32 %v2245_v12, %v6147_v36  ;;  %v6156_v41 = vsub.f32 %v2248_v50, %v6149_v10  ;;  %v2187_v37 = vsel %vm2171_vm1, %v2170_v15, %v2138_v23  ;;  %4094 = vmatprep.mubr.f32.mxu0 %v2451_v62  ;;  %4137 = vmatmul.mubr.f32.gmra.mxu1 %v6147_v36  ;;  %v6481_v62 = vand.u32 4294901760, %v5914_v16 }
 0x370   :  { %v2251_v38 = vsel %vm2204_vm13, %v2187_v37, 0  ;;  %4139 = vmatprep.mubr.f32.mxu1 %v6149_v10  ;;  %v6482_v23 = vand.u32 4294901760, %v5939_v6 }
 0x371   :  { %v6162_v3 = vand.u32 4294901760, %v2251_v38  ;;  %v2459_v1 = vand.u32 4294901760, %v6153_v54  ;;  %v2469_v43 = vand.u32 4294901760, %v6156_v41 }
 0x373   :  { %v6167_v0 = vsub.f32 %v2251_v38, %v6162_v3  ;;  %4140 = vmatmul.mubr.f32.gmra.mxu1 %v6162_v3  ;;  %v2460_v46 = vsub.f32 %v6153_v54, %v2459_v1  ;;  %v2470_v63 = vsub.f32 %v6156_v41, %v2469_v43  ;;  %v6484_v38 = vand.u32 4294901760, %v5977_v60 }
 0x374   :  { %4202 = vmatprep.mubr.f32.mxu1 %v2329_v18  ;;  %v6483_v18 = vand.u32 4294901760, %v5951_v31 }
 0x375   :  { %v2461_v12 = vand.u32 4294901760, %v2460_v46  ;;  %v2471_v50 = vand.u32 4294901760, %v2470_v63  ;;  %v2479_v25 = vand.u32 4294901760, %v6167_v0  ;;  %v6485_v46 = vand.u32 4294901760, %v6035_v11 }
 0x377   :  { %4095 = vmatmul.mubr.f32.gmra.mxu0 %v2461_v12  ;;  %4203 = vmatmul.mubr.f32.vlgmr.msra.gmra.mxu1 %v6481_v62  ;;  %v2480_v15 = vsub.f32 %v6167_v0, %v2479_v25 }
 0x378   :  { %4097 = vmatprep.mubr.f32.mxu0 %v2471_v50  ;;  %4205 = vmatprep.mubr.f32.mxu1 %v6482_v23 }
 0x379   :  { %v2481_v37 = vand.u32 4294901760, %v2480_v15  ;;  %4269 = vmatpush3.msra.mxu1 %v5584_v40  ;;  %v6486_v40 = vand.u32 4294901760, %v6018_v52 }
 0x37a   :  { %4270 = vmatprep.subr.mxu1 %v5586_v33 }
 0x37b   :  { %4098 = vmatmul.mubr.f32.gmra.mxu0 %v2481_v37  ;;  %4206 = vmatmul.mubr.f32.gmra.mxu1 %v6483_v18  ;;  %v6363_v37 = vld [vmem:[%s6458_s4] ss:$0 sm:$0xff]  ;;  %s4346_s4 = smov [#allocation2]  }
 0x37c   :  { %4160 = vmatprep.mubr.f32.mxu0 %v5903_v32  ;;  %4208 = vmatprep.mubr.f32.mxu1 %v6484_v38  ;;  %s3517_s12 = sshll.u32 %s4346_s4, 4  ;;  %s3518_s12 = int_to_ptr.vmem [resolvable:$true] %s3517_s12 }
 0x37d   :  { %4271 = vmatpush3.msra.mxu1 %v5586_v33  ;;  %v6487_v33 = vand.u32 4294901760, %v6024_v39  ;;  %s4318_s13 = scalar_lea.vmem %s3518_s12, 2048  ;;  %p4323_p1 = scmp.lt.s32.totalorder %s3518_s12, %s3518_s12 }
 0x37e   :  { %4272 = vmatprep.subr.mxu1 %v5588_v4  ;;  %p4319_p0 = scmp.ne.s32.totalorder %s3518_s12, %s4318_s13  ;;  %p4324_p2 = scmp.lt.s32.totalorder %s4318_s13, %s4318_s13 }
 0x37f   :  { %4161 = vmatmul.mubr.f32.vlgmr.msra.gmra.mxu0 %v5914_v16  ;;  %4209 = vmatmul.mubr.f32.gmra.mxu1 %v6485_v46 }
 0x380   :  { %4227 = vmatpush3.msra.mxu0 %v5610_v7  ;;  %4163 = vmatprep.mubr.f32.mxu0 %v5939_v6  ;;  %v6488_v7 = vand.u32 4294901760, %v6064_v5  ;;  %p4325_p3 = por %p4324_p2, %p4323_p1 }
 0x381   :  { %4211 = vmatprep.mubr.f32.mxu1 %v6486_v40  ;;  %4228 = vmatprep.subr.mxu0 %v5613_v42 }
 0x382   :  { %4229 = vmatpush3.msra.mxu0 %v5613_v42  ;;  %4273 = vmatpush3.msra.mxu1 %v5588_v4  ;;  %v6489_v4 = vand.u32 4294901760, %v6078_v17  ;;  %v6490_v42 = vand.u32 4294901760, %v6099_v49  ;;  %p4326_p4 = pnand %p4325_p3, %p4319_p0 }
 0x383   :  { %4164 = vmatmul.mubr.f32.gmra.mxu0 %v5951_v31  ;;  %4212 = vmatmul.mubr.f32.gmra.mxu1 %v6487_v33 }
 0x384   :  { %4166 = vmatprep.mubr.f32.mxu0 %v5977_v60  ;;  %4214 = vmatprep.mubr.f32.mxu1 %v6488_v7 }
 0x385   :  { %4230 = vmatprep.subr.mxu0 %v5616_v14  ;;  %4274 = vmatprep.subr.mxu1 %v5593_v24 }
 0x386   :  { %4231 = vmatpush3.msra.mxu0 %v5616_v14  ;;  %4275 = vmatpush3.msra.mxu1 %v5593_v24  ;;  %v6491_v24 = vand.u32 4294901760, %v6109_v61 }
 0x387   :  { %4167 = vmatmul.mubr.f32.gmra.mxu0 %v6035_v11  ;;  %4215 = vmatmul.mubr.f32.gmra.mxu1 %v6489_v4 }
 0x388   :  { %4169 = vmatprep.mubr.f32.mxu0 %v6018_v52  ;;  %4217 = vmatprep.mubr.f32.mxu1 %v6490_v42 }
 0x389   :  { %4232 = vmatprep.subr.mxu0 %v5620_v51  ;;  %4276 = vmatprep.subr.mxu1 %v5638_v48 }
 0x38a   :  { %4233 = vmatpush3.msra.mxu0 %v5620_v51  ;;  %4277 = vmatpush3.msra.mxu1 %v5638_v48 }
 0x38b   :  { %4170 = vmatmul.mubr.f32.gmra.mxu0 %v6024_v39  ;;  %4218 = vmatmul.mubr.f32.gmra.mxu1 %v6491_v24 }
 0x38c   :  { %4172 = vmatprep.mubr.f32.mxu0 %v6064_v5  ;;  %4220 = vmatprep.mubr.f32.mxu1 %v2449_v2 }
 0x38d   :  { %4234 = vmatprep.subr.mxu0 %v5654_v34  ;;  %4278 = vmatprep.subr.mxu1 %v5646_v30 }
 0x38e   :  { %4235 = vmatpush3.msra.mxu0 %v5654_v34  ;;  %4279 = vmatpush3.msra.mxu1 %v5646_v30 }
 0x38f   :  { %4173 = vmatmul.mubr.f32.gmra.mxu0 %v6078_v17  ;;  %4221 = vmatmul.mubr.f32.gmra.mxu1 %v2459_v1 }
 0x390   :  { %4175 = vmatprep.mubr.f32.mxu0 %v6099_v49  ;;  %4223 = vmatprep.mubr.f32.mxu1 %v2469_v43 }
 0x391   :  { %4236 = vmatprep.subr.mxu0 %v5669_v47  ;;  %4280 = vmatprep.subr.mxu1 %v5659_v44 }
 0x392   :  { %4237 = vmatpush3.msra.mxu0 %v5669_v47  ;;  %4281 = vmatpush3.msra.mxu1 %v5659_v44 }
 0x393   :  { %4176 = vmatmul.mubr.f32.gmra.mxu0 %v6109_v61  ;;  %4224 = vmatmul.mubr.f32.gmra.mxu1 %v2479_v25 }
 0x394   :  { %4282 = vmatprep.subr.mxu1 %v5674_v35  ;;  %4178 = vmatprep.mubr.f32.mxu0 %v6127_v56 }
 0x395   :  { %4238 = vmatprep.subr.mxu0 %v5684_v53  ;;  %4283 = vmatpush3.msra.mxu1 %v5674_v35 }
 0x396   :  { %4286 = vmatprep.mubr.f32.mxu1 %v5898_v22  ;;  %4239 = vmatpush3.msra.mxu0 %v5684_v53 }
 0x397   :  { %4284 = vmatprep.subr.mxu1 %v5690_v27  ;;  %4179 = vmatmul.mubr.f32.gmra.mxu0 %v6153_v54 }
 0x398   :  { %4285 = vmatpush3.msra.mxu1 %v5690_v27  ;;  %4240 = vmatprep.subr.mxu0 %v5696_v59 }
 0x399   :  { %4287 = vmatmul.mubr.f32.vlgmr.msra.gmra.mxu1 %v5908_v58  ;;  %4181 = vmatprep.mubr.f32.mxu0 %v6156_v41 }
 0x39a   :  { %4241 = vmatpush3.msra.mxu0 %v5696_v59  ;;  %4289 = vmatprep.mubr.f32.mxu1 %v5929_v55 }
 0x39b   :  { %4182 = vmatmul.mubr.f32.gmra.mxu0 %v6167_v0  ;;  %4242 = vmatprep.subr.mxu0 %v5706_v21 }
 0x39c   :  { %4243 = vmatpush3.msra.mxu0 %v5706_v21  ;;  %4244 = vmatprep.mubr.f32.mxu0 %v5898_v22 }
 0x39d   :  { %4290 = vmatmul.mubr.f32.gmra.mxu1 %v5943_v45 }
 0x39e   :  { %4292 = vmatprep.mubr.f32.mxu1 %v5966_v57 }
 0x39f   :  { %4245 = vmatmul.mubr.f32.vlgmr.msra.gmra.mxu0 %v5908_v58 }
 0x3a0   :  { %4247 = vmatprep.mubr.f32.mxu0 %v5929_v55 }
 0x3a1   :  { %4293 = vmatmul.mubr.f32.gmra.mxu1 %v6026_v8 }
 0x3a2   :  { %4295 = vmatprep.mubr.f32.mxu1 %v6009_v29 }
 0x3a3   :  { %4248 = vmatmul.mubr.f32.gmra.mxu0 %v5943_v45 }
 0x3a4   :  { %4250 = vmatprep.mubr.f32.mxu0 %v5966_v57 }
 0x3a5   :  { %4296 = vmatmul.mubr.f32.gmra.mxu1 %v6003_v13 }
 0x3a6   :  { %4298 = vmatprep.mubr.f32.mxu1 %v6050_v26 }
 0x3a7   :  { %4251 = vmatmul.mubr.f32.gmra.mxu0 %v6026_v8 }
 0x3a8   :  { %4253 = vmatprep.mubr.f32.mxu0 %v6009_v29 }
 0x3a9   :  { %4299 = vmatmul.mubr.f32.gmra.mxu1 %v6069_v19 }
 0x3aa   :  { %4301 = vmatprep.mubr.f32.mxu1 %v6091_v28 }
 0x3ab   :  { %4254 = vmatmul.mubr.f32.gmra.mxu0 %v6003_v13 }
 0x3ac   :  { %4256 = vmatprep.mubr.f32.mxu0 %v6050_v26 }
 0x3ad   :  { %4302 = vmatmul.mubr.f32.gmra.mxu1 %v6103_v20 }
 0x3ae   :  { %4304 = vmatprep.mubr.f32.mxu1 %v6120_v9 }
 0x3af   :  { %4257 = vmatmul.mubr.f32.gmra.mxu0 %v6069_v19 }
 0x3b0   :  { %4259 = vmatprep.mubr.f32.mxu0 %v6091_v28 }
 0x3b1   :  { %4305 = vmatmul.mubr.f32.gmra.mxu1 %v6147_v36 }
 0x3b2   :  { %4307 = vmatprep.mubr.f32.mxu1 %v6149_v10 }
 0x3b3   :  { %4260 = vmatmul.mubr.f32.gmra.mxu0 %v6103_v20 }
 0x3b4   :  { %4262 = vmatprep.mubr.f32.mxu0 %v6120_v9 }
 0x3b5   :  { %4308 = vmatmul.mubr.f32.gmra.mxu1 %v6162_v3 }
 0x3b7   :  { %4263 = vmatmul.mubr.f32.gmra.mxu0 %v6147_v36 }
 0x3b8   :  { %4265 = vmatprep.mubr.f32.mxu0 %v6149_v10 }
 0x3bb   :  { %4266 = vmatmul.mubr.f32.gmra.mxu0 %v6162_v3 }
 0x3fa   :  { %v6282_v14 = vpop.f32.mrf.mxu1 }
 0x3fc   :  { %v6284_v51 = vpop.f32.mrf.mxu1 }
 0x402   :  { %v6286_v48 = vpop.f32.mrf.mxu1  ;;  %v4078_v30 = vpop.f32.mrf.mxu0 }
 0x403   :  { %v2344_v33 = vadd.f32 %v4078_v30, %v6363_v37 }
 0x404   :  { %v6288_v34 = vpop.f32.mrf.mxu1  ;;  %v2333_v44 = vpop.f32.mrf.mxu0 }
 0x405   :  { %v2334_v42 = vadd.f32 %v6363_v37, %v2333_v44 }
 0x40a   :  { %v4081_v35 = vpop.f32.mrf.mxu0 }
 0x40c   :  { %v2353_v27 = vpop.f32.mrf.mxu0 }
 0x40d   :  { %v2354_v30 = vadd.f32 %v6363_v37, %v2353_v27 }
 0x412   :  { %v6290_v47 = vpop.f32.mrf.mxu1 }
 0x414   :  { %v6292_v53 = vpop.f32.mrf.mxu1 }
 0x416   :  { %v6294_v59 = vpop.f32.mrf.mxu1 }
 0x418   :  { %v6296_v22 = vpop.f32.mrf.mxu1 }
 0x41a   :  { %v4084_v21 = vpop.f32.mrf.mxu0  ;;  %v6298_v58 = vpop.f32.mrf.mxu1 }
 0x41c   :  { %v2373_v32 = vpop.f32.mrf.mxu0  ;;  %v6300_v55 = vpop.f32.mrf.mxu1 }
 0x41d   :  { %v2374_v44 = vadd.f32 %v6363_v37, %v2373_v32  ;;  %v2612_v32 = vadd.f32 %v6288_v34, %v2354_v30 }
 0x41e   :  { %v4087_v16 = vpop.f32.mrf.mxu0 }
 0x420   :  { %v6302_v6 = vpop.f32.mrf.mxu0 }
 0x422   :  { %v6304_v45 = vpop.f32.mrf.mxu1  ;;  %v6306_v31 = vpop.f32.mrf.mxu0 }
 0x424   :  { %v6308_v2 = vpop.f32.mrf.mxu1  ;;  %v6310_v57 = vpop.f32.mrf.mxu0 }
 0x42a   :  { %v6314_v13 = vpop.f32.mrf.mxu0 }
 0x42c   :  { %v6320_v39 = vpop.f32.mrf.mxu0 }
 0x42f   :  { %v6312_v60 = vpop.f32.mrf.mxu1 }
 0x431   :  { %v6316_v29 = vpop.f32.mrf.mxu1 }
 0x433   :  { %v6318_v52 = vpop.f32.mrf.mxu1 }
 0x434   :  { %6492 = vst [vmem:[#allocation7_spill] sm:$0xff] %v6318_v52 }
 0x435   :  { %v6322_v8 = vpop.f32.mrf.mxu1 }
 0x436   :  { %6493 = vst [vmem:[#allocation5_spill] sm:$0xff] %v6322_v8  ;;  %v2364_v8 = vadd.f32 %v4081_v35, %v6363_v37 }
 0x437   :  { %v6324_v11 = vpop.f32.mrf.mxu0  ;;  %v4204_v26 = vpop.f32.mrf.mxu1 }
 0x438   :  { %v2618_v35 = vadd.f32 %v6286_v48, %v2364_v8 }
 0x439   :  { %v6326_v5 = vpop.f32.mrf.mxu0  ;;  %v2966_v19 = vpop.f32.mrf.mxu1 }
 0x43b   :  { %v6328_v17 = vpop.f32.mrf.mxu0  ;;  %v6330_v28 = vpop.f32.mrf.mxu1 }
 0x43d   :  { %v6332_v49 = vpop.f32.mrf.mxu0  ;;  %v6334_v20 = vpop.f32.mrf.mxu1 }
 0x43e   :  { %6494 = vst [vmem:[#allocation6_spill] sm:$0xff] %v6332_v49 }
 0x43f   :  { %v4162_v61 = vpop.f32.mrf.mxu0  ;;  %v6336_v9 = vpop.f32.mrf.mxu1 }
 0x441   :  { %v2779_v56 = vpop.f32.mrf.mxu0  ;;  %v6338_v36 = vpop.f32.mrf.mxu1 }
 0x443   :  { %v4165_v10 = vpop.f32.mrf.mxu0  ;;  %v6340_v54 = vpop.f32.mrf.mxu1 }
 0x445   :  { %v2793_v41 = vpop.f32.mrf.mxu0  ;;  %v6342_v3 = vpop.f32.mrf.mxu1 }
 0x447   :  { %v4168_v1 = vpop.f32.mrf.mxu0  ;;  %v6344_v43 = vpop.f32.mrf.mxu1 }
 0x449   :  { %v2807_v0 = vpop.f32.mrf.mxu0  ;;  %v6346_v63 = vpop.f32.mrf.mxu1 }
 0x44b   :  { %v6348_v12 = vpop.f32.mrf.mxu0  ;;  %v6350_v50 = vpop.f32.mrf.mxu1 }
 0x44c   :  { %6495 = vst [vmem:[#allocation8_spill] sm:$0xff] %v6350_v50  ;;  %v2384_v50 = vadd.f32 %v4084_v21, %v6363_v37  ;;  %v2424_v21 = vadd.f32 %v6306_v31, %v6363_v37 }
 0x44d   :  { %v6352_v25 = vpop.f32.mrf.mxu0  ;;  %v6354_v62 = vpop.f32.mrf.mxu1 }
 0x44e   :  { %6496 = vst [vmem:[#allocation9_spill] sm:$0xff] %v6354_v62  ;;  %v2630_v48 = vadd.f32 %v6290_v47, %v2384_v50 }
 0x44f   :  { %v6356_v15 = vpop.f32.mrf.mxu0  ;;  %v6358_v23 = vpop.f32.mrf.mxu1 }
 0x450   :  { %6497 = vst [vmem:[#allocation10_spill] sm:$0xff] %v6358_v23  ;;  %v2606_v23 = vadd.f32 %v6282_v14, %v2344_v33  ;;  %v2404_v14 = vadd.f32 %v4087_v16, %v6363_v37 }
 0x451   :  { %v6365_v18 = vpop.f32.mrf.mxu0  ;;  %v6367_v38 = vpop.f32.mrf.mxu1 }
 0x452   :  { %6498 = vst [vmem:[#allocation11_spill] sm:$0xff] %v6367_v38  ;;  %v2787_v52 = vadd.f32 %v4162_v61, %v2606_v23  ;;  %v2801_v61 = vadd.f32 %v4165_v10, %v2618_v35  ;;  %v2414_v23 = vadd.f32 %v6363_v37, %v6310_v57  ;;  %v2642_v31 = vadd.f32 %v6294_v59, %v2404_v14 }
 0x453   :  { %v6369_v46 = vpop.f32.mrf.mxu0  ;;  %v6371_v40 = vpop.f32.mrf.mxu1 }
 0x454   :  { %6499 = vst [vmem:[#allocation12_spill] sm:$0xff] %v6371_v40  ;;  %v2600_v40 = vadd.f32 %v6284_v51, %v2334_v42  ;;  %v2394_v51 = vadd.f32 %v6363_v37, %v6302_v6  ;;  %v2975_v27 = vadd.f32 %v4204_v26, %v2787_v52  ;;  %v2444_v6 = vadd.f32 %v6314_v13, %v6363_v37 }
 0x455   :  { %v6374_v7 = vpop.f32.mrf.mxu0  ;;  %v6376_v4 = vpop.f32.mrf.mxu1  ;;  %v2794_v52 = vadd.f32 %v2793_v41, %v2612_v32  ;;  %v2815_v26 = vadd.f32 %v4168_v1, %v2630_v48  ;;  %v2991_v47 = vadd.f32 %v6330_v28, %v2801_v61  ;;  %v2648_v13 = vadd.f32 %v6300_v55, %v2414_v23 }
 0x456   :  { %6500 = vst [vmem:[#allocation13_spill] sm:$0xff] %v6374_v7  ;;  %6501 = vst [vmem:[#allocation14_spill] sm:$0xff] %v6376_v4  ;;  %v2636_v57 = vadd.f32 %v6296_v22, %v2394_v51  ;;  %v2829_v22 = vadd.f32 %v6348_v12, %v2642_v31  ;;  %v2464_v61 = vadd.f32 %v6324_v11, %v6363_v37 }
 0x457   :  { %v6379_v24 = vpop.f32.mrf.mxu0  ;;  %v2983_v28 = vadd.f32 %v6334_v20, %v2794_v52 }
 0x458   :  { %6502 = vst [vmem:[#allocation15_spill] sm:$0xff] %v6379_v24  ;;  %v2780_v24 = vadd.f32 %v2779_v56, %v2600_v40  ;;  %v2624_v56 = vadd.f32 %v6292_v53, %v2374_v44  ;;  %v2434_v53 = vadd.f32 %v6363_v37, %v6320_v39  ;;  %v3007_v39 = vadd.f32 %v6336_v9, %v2815_v26 }
 0x459   :  { %v4288_v62 = vpop.f32.mrf.mxu1  ;;  %v6383_v38 = vpop.f32.mrf.mxu0  ;;  %v2454_v9 = vadd.f32 %v6363_v37, %v6326_v5  ;;  %v2678_v52 = vadd.f32 %v6312_v60, %v2464_v61 }
 0x45a   :  { %v2967_v42 = vadd.f32 %v2966_v19, %v2780_v24  ;;  %v2808_v50 = vadd.f32 %v2807_v0, %v2624_v56  ;;  %v2654_v19 = vadd.f32 %v6298_v58, %v2424_v21 }
 0x45b   :  { %v3354_v7 = vpop.f32.mrf.mxu1  ;;  %v6388_v4 = vpop.f32.mrf.mxu0 }
 0x45c   :  { %v2843_v48 = vadd.f32 %v6356_v15, %v2654_v19 }
 0x45d   :  { %v4291_v33 = vpop.f32.mrf.mxu1  ;;  %v6393_v49 = vpop.f32.mrf.mxu0 }
 0x45f   :  { %v3366_v8 = vpop.f32.mrf.mxu1  ;;  %v4246_v16 = vpop.f32.mrf.mxu0 }
 0x460   :  { %v3191_v40 = vadd.f32 %v4246_v16, %v2975_v27 }
 0x461   :  { %v4294_v10 = vpop.f32.mrf.mxu1  ;;  %v3184_v35 = vpop.f32.mrf.mxu0 }
 0x462   :  { %v3361_v34 = vadd.f32 %v4288_v62, %v3191_v40  ;;  %v3185_v30 = vadd.f32 %v3184_v35, %v2967_v42  ;;  %v2666_v62 = vadd.f32 %v6304_v45, %v2444_v6  ;;  %v2999_v45 = vadd.f32 %v6338_v36, %v2808_v50 }
 0x463   :  { %v3378_v41 = vpop.f32.mrf.mxu1  ;;  %v4249_v1 = vpop.f32.mrf.mxu0  ;;  %v3023_v36 = vadd.f32 %v6340_v54, %v2829_v22  ;;  %v2836_v6 = vadd.f32 %v6365_v18, %v2648_v13  ;;  %v3039_v18 = vadd.f32 %v6344_v43, %v2843_v48  ;;  %v2672_v50 = vadd.f32 %v6316_v29, %v2454_v9  ;;  %v6509_v48 = vld [vmem:[#allocation10_spill] sm:$0xff] }
 0x464   :  { %vm3449_vm3 = vcmp.ge.f32.partialorder %v3361_v34, 0.0  ;;  %v3465_v59 = vmul.f32 0.01, %v3361_v34  ;;  %v3355_v24 = vadd.f32 %v3354_v7, %v3185_v30  ;;  %v3203_v44 = vadd.f32 %v4249_v1, %v2991_v47 }
 0x465   :  { %v4297_v14 = vpop.f32.mrf.mxu1  ;;  %v3196_v51 = vpop.f32.mrf.mxu0  ;;  %v2660_v7 = vadd.f32 %v6308_v2, %v2434_v53  ;;  %v2857_v35 = vadd.f32 %v6369_v46, %v2666_v62  ;;  %v2484_v53 = vadd.f32 %v6328_v17, %v6363_v37  ;;  %v3031_v13 = vadd.f32 %v6346_v63, %v2836_v6  ;;  %v6505_v62 = vld [vmem:[#allocation15_spill] sm:$0xff] }
 0x466   :  { %v3481_v0 = vsel %vm3449_vm3, %v3361_v34, %v3465_v59  ;;  %vm3448_vm4 = vcmp.ge.f32.partialorder %v3355_v24, 0.0  ;;  %v3464_v58 = vmul.f32 0.01, %v3355_v24  ;;  %v3373_v55 = vadd.f32 %v4291_v33, %v3203_v44  ;;  %v6503_v59 = vld [vmem:[#allocation6_spill] sm:$0xff]  ;;  %v6504_v44 = vld [vmem:[#allocation13_spill] sm:$0xff]  ;;  %v6511_v6 = vld [vmem:[#allocation11_spill] sm:$0xff] }
 0x467   :  { %3497 = vst [vmem:[#allocation2 + $0x8] sm:$0xff] %v3481_v0  ;;  %v3197_v27 = vadd.f32 %v3196_v51, %v2983_v28  ;;  %v3390_v12 = vpop.f32.mrf.mxu1  ;;  %v4252_v21 = vpop.f32.mrf.mxu0  ;;  %v2822_v33 = vadd.f32 %v6352_v25, %v2636_v57  ;;  %v2850_v22 = vadd.f32 %v6504_v44, %v2660_v7  ;;  %v6506_v0 = vld [vmem:[#allocation8_spill] sm:$0xff] }
 0x468   :  { %v3480_v23 = vsel %vm3448_vm4, %v3355_v24, %v3464_v58  ;;  %vm3451_vm6 = vcmp.ge.f32.partialorder %v3373_v55, 0.0  ;;  %v3467_v20 = vmul.f32 0.01, %v3373_v55  ;;  %v3215_v32 = vadd.f32 %v4252_v21, %v3007_v39 }
 0x469   :  { %3496 = vst [vmem:[#allocation2] sm:$0xff] %v3480_v23  ;;  %v3367_v11 = vadd.f32 %v3366_v8, %v3197_v27  ;;  %v4300_v2 = vpop.f32.mrf.mxu1  ;;  %v3208_v16 = vpop.f32.mrf.mxu0  ;;  %v3015_v34 = vadd.f32 %v6342_v3, %v2822_v33  ;;  %v2474_v24 = vadd.f32 %v6363_v37, %v6503_v59  ;;  %v3055_v63 = vadd.f32 %v6506_v0, %v2857_v35 }
 0x46a   :  { %v3483_v56 = vsel %vm3451_vm6, %v3373_v55, %v3467_v20  ;;  %v3385_v40 = vadd.f32 %v4294_v10, %v3215_v32  ;;  %v3209_v42 = vadd.f32 %v3208_v16, %v2999_v45  ;;  %v2864_v58 = vadd.f32 %v6383_v38, %v2672_v50  ;;  %v6507_v55 = vld [vmem:[#allocation7_spill] sm:$0xff]  ;;  %v6508_v32 = vld [vmem:[#allocation9_spill] sm:$0xff] }
 0x46b   :  { %3499 = vst [vmem:[#allocation2 + $0x18] sm:$0xff] %v3483_v56  ;;  %vm3450_vm14 = vcmp.ge.f32.partialorder %v3367_v11, 0.0  ;;  %v3466_v5 = vmul.f32 0.01, %v3367_v11  ;;  %v3402_v26 = vpop.f32.mrf.mxu1  ;;  %v4255_v25 = vpop.f32.mrf.mxu0  ;;  %v2690_v61 = vadd.f32 %v6507_v55, %v2484_v53  ;;  %v3047_v9 = vadd.f32 %v6508_v32, %v2850_v22  ;;  %v6510_v56 = vld [vmem:[#allocation5_spill] sm:$0xff] }
 0x46c   :  { %vm3453_vm15 = vcmp.ge.f32.partialorder %v3385_v40, 0.0  ;;  %v3469_v15 = vmul.f32 0.01, %v3385_v40  ;;  %v3379_v31 = vadd.f32 %v3378_v41, %v3209_v42  ;;  %v3227_v8 = vadd.f32 %v4255_v25, %v3023_v36 }
 0x46d   :  { %v3482_v57 = vsel %vm3450_vm14, %v3367_v11, %v3466_v5  ;;  %v4303_v10 = vpop.f32.mrf.mxu1  ;;  %v3220_v54 = vpop.f32.mrf.mxu0 }
 0x46e   :  { %3498 = vst [vmem:[#allocation2 + $0x10] sm:$0xff] %v3482_v57  ;;  %v3485_v60 = vsel %vm3453_vm15, %v3385_v40, %v3469_v15  ;;  %vm3452_vm0 = vcmp.ge.f32.partialorder %v3379_v31, 0.0  ;;  %v3468_v30 = vmul.f32 0.01, %v3379_v31  ;;  %v3397_v47 = vadd.f32 %v4297_v14, %v3227_v8 }
 0x46f   :  { %3501 = vst [vmem:[#allocation2 + $0x28] sm:$0xff] %v3485_v60  ;;  %v3221_v19 = vadd.f32 %v3220_v54, %v3015_v34  ;;  %v4258_v46 = vpop.f32.mrf.mxu0  ;;  %v3414_v1 = vpop.f32.mrf.mxu1  ;;  %v2871_v14 = vadd.f32 %v6505_v62, %v2678_v52  ;;  %v2684_v40 = vadd.f32 %v6510_v56, %v2474_v24  ;;  %v3063_v52 = vadd.f32 %v6511_v6, %v2864_v58  ;;  %v6512_v34 = vld [vmem:[#allocation12_spill] sm:$0xff] }
 0x470   :  { %v3484_v41 = vsel %vm3452_vm0, %v3379_v31, %v3468_v30  ;;  %vm3455_vm2 = vcmp.ge.f32.partialorder %v3397_v47, 0.0  ;;  %v3471_v3 = vmul.f32 0.01, %v3397_v47  ;;  %v3239_v43 = vadd.f32 %v4258_v46, %v3039_v18  ;;  %v6513_v46 = vld [vmem:[#allocation14_spill] sm:$0xff] }
 0x471   :  { %3500 = vst [vmem:[#allocation2 + $0x20] sm:$0xff] %v3484_v41  ;;  %v3391_v17 = vadd.f32 %v3390_v12, %v3221_v19  ;;  %v3232_v29 = vpop.f32.mrf.mxu0  ;;  %v4306_v21 = vpop.f32.mrf.mxu1  ;;  %v2885_v12 = vadd.f32 %v6388_v4, %v2690_v61  ;;  %v3071_v11 = vadd.f32 %v6509_v48, %v2871_v14  ;;  %v2878_v15 = vadd.f32 %v6393_v49, %v2684_v40 }
 0x472   :  { %v3487_v28 = vsel %vm3455_vm2, %v3397_v47, %v3471_v3  ;;  %v3409_v51 = vadd.f32 %v4300_v2, %v3239_v43  ;;  %v3233_v39 = vadd.f32 %v3232_v29, %v3031_v13 }
 0x473   :  { %3503 = vst [vmem:[#allocation2 + $0x38] sm:$0xff] %v3487_v28  ;;  %vm3454_vm5 = vcmp.ge.f32.partialorder %v3391_v17, 0.0  ;;  %v3470_v27 = vmul.f32 0.01, %v3391_v17  ;;  %v4261_v37 = vpop.f32.mrf.mxu0  ;;  %v3426_v4 = vpop.f32.mrf.mxu1  ;;  %v3087_v54 = vadd.f32 %v6512_v34, %v2885_v12  ;;  %v3079_v49 = vadd.f32 %v6513_v46, %v2878_v15 }
 0x474   :  { %vm3457_vm7 = vcmp.ge.f32.partialorder %v3409_v51, 0.0  ;;  %v3473_v7 = vmul.f32 0.01, %v3409_v51  ;;  %v3403_v45 = vadd.f32 %v3402_v26, %v3233_v39  ;;  %v3251_v23 = vadd.f32 %v4261_v37, %v3055_v63 }
 0x475   :  { %v3486_v20 = vsel %vm3454_vm5, %v3391_v17, %v3470_v27  ;;  %v3244_v33 = vpop.f32.mrf.mxu0  ;;  %v4309_v30 = vpop.f32.mrf.mxu1 }
 0x476   :  { %3502 = vst [vmem:[#allocation2 + $0x30] sm:$0xff] %v3486_v20  ;;  %v3489_v38 = vsel %vm3457_vm7, %v3409_v51, %v3473_v7  ;;  %vm3456_vm8 = vcmp.ge.f32.partialorder %v3403_v45, 0.0  ;;  %v3472_v2 = vmul.f32 0.01, %v3403_v45  ;;  %v3421_v16 = vadd.f32 %v4303_v10, %v3251_v23 }
 0x477   :  { %3505 = vst [vmem:[#allocation2 + $0x48] sm:$0xff] %v3489_v38  ;;  %v3245_v42 = vadd.f32 %v3244_v33, %v3047_v9  ;;  %v4264_v36 = vpop.f32.mrf.mxu0  ;;  %v3438_v59 = vpop.f32.mrf.mxu1 }
 0x478   :  { %v3488_v5 = vsel %vm3456_vm8, %v3403_v45, %v3472_v2  ;;  %vm3459_vm9 = vcmp.ge.f32.partialorder %v3421_v16, 0.0  ;;  %v3475_v26 = vmul.f32 0.01, %v3421_v16  ;;  %v3263_v25 = vadd.f32 %v4264_v36, %v3071_v11 }
 0x479   :  { %3504 = vst [vmem:[#allocation2 + $0x40] sm:$0xff] %v3488_v5  ;;  %v3415_v31 = vadd.f32 %v3414_v1, %v3245_v42  ;;  %v3256_v8 = vpop.f32.mrf.mxu0 }
 0x47a   :  { %v3491_v35 = vsel %vm3459_vm9, %v3421_v16, %v3475_v26  ;;  %v3433_v57 = vadd.f32 %v4306_v21, %v3263_v25  ;;  %v3257_v10 = vadd.f32 %v3256_v8, %v3063_v52 }
 0x47b   :  { %3507 = vst [vmem:[#allocation2 + $0x58] sm:$0xff] %v3491_v35  ;;  %vm3458_vm10 = vcmp.ge.f32.partialorder %v3415_v31, 0.0  ;;  %v3474_v18 = vmul.f32 0.01, %v3415_v31  ;;  %v4267_v60 = vpop.f32.mrf.mxu0 }
 0x47c   :  { %vm3461_vm11 = vcmp.ge.f32.partialorder %v3433_v57, 0.0  ;;  %v3477_v47 = vmul.f32 0.01, %v3433_v57  ;;  %v3427_v53 = vadd.f32 %v3426_v4, %v3257_v10  ;;  %v3275_v50 = vadd.f32 %v4267_v60, %v3087_v54 }
 0x47d   :  { %v3490_v19 = vsel %vm3458_vm10, %v3415_v31, %v3474_v18  ;;  %v3268_v13 = vpop.f32.mrf.mxu0 }
 0x47e   :  { %3506 = vst [vmem:[#allocation2 + $0x50] sm:$0xff] %v3490_v19  ;;  %v3493_v41 = vsel %vm3461_vm11, %v3433_v57, %v3477_v47  ;;  %vm3460_vm12 = vcmp.ge.f32.partialorder %v3427_v53, 0.0  ;;  %v3476_v3 = vmul.f32 0.01, %v3427_v53  ;;  %v3445_v1 = vadd.f32 %v4309_v30, %v3275_v50 }
 0x47f   :  { %3509 = vst [vmem:[#allocation2 + $0x68] sm:$0xff] %v3493_v41  ;;  %v3269_v43 = vadd.f32 %v3268_v13, %v3079_v49 }
 0x480   :  { %v3492_v24 = vsel %vm3460_vm12, %v3427_v53, %v3476_v3  ;;  %vm3463_vm1 = vcmp.ge.f32.partialorder %v3445_v1, 0.0  ;;  %v3479_v44 = vmul.f32 0.01, %v3445_v1 }
 0x481   :  { %3508 = vst [vmem:[#allocation2 + $0x60] sm:$0xff] %v3492_v24  ;;  %v3439_v22 = vadd.f32 %v3438_v59, %v3269_v43 }
 0x482   :  { %v3495_v62 = vsel %vm3463_vm1, %v3445_v1, %v3479_v44 }
 0x483   :  { %3511 = vst [vmem:[#allocation2 + $0x78] sm:$0xff] %v3495_v62  ;;  %vm3462_vm13 = vcmp.ge.f32.partialorder %v3439_v22, 0.0  ;;  %v3478_v14 = vmul.f32 0.01, %v3439_v22 }
 0x485   :  { %v3494_v17 = vsel %vm3462_vm13, %v3439_v22, %v3478_v14 }
 0x486   :  { %3510 = vst [vmem:[#allocation2 + $0x70] sm:$0xff] %v3494_v17 }
 0x487   :  { %4329 = shalt.err (!%p4326_p4)
}
 0x488   :  { %s4347_s14 = smov 128  }
 0x489   :  { %3523 = dma.vmem_to_hbm [thread:$0]  %s3518_s12, 2048, %s6459_s5, [#allocation3], %s4347_s14, %s4347_s14, %s4340_s27  }
 0x48a   :  { %4338 = dma.done.wait [#allocation3], 2048  }
 0x48b   :  { %4339 = vsyncadd [#allocation3], 4294965248 }
 0x48c   :  { %3527 = vsyncpa [#allocation3], 1 }

</bundles_post_ra>
